<compile_context>
chip_gen: v6e
topology: v6e:2x2x1
jax: 0.10.0
libtpu: 0.0.40
codegen_flags: <defaults>
</compile_context>

<pallas_src>
import functools

import jax
import jax.numpy as jnp
from jax.experimental import pallas as pl
from jax.experimental.pallas import tpu as pltpu


def _round_up(x, m):
    return (x + m - 1) // m * m


# ----------------------------------------------------------------------------
# Fused Pallas kernel: shared MLP (1x1 Conv + BN(eval) + ReLU)  +  graph attention
# ----------------------------------------------------------------------------

def _make_fused_kernel(n_extra_layers, nsample, alpha):
    """Ref layout:
         cxyz [1,TS,XP] f32, cfeat [1,TS,DF] f32,
         gxyz [1,ns,TS,XP] f32 (grouped_xyz_norm, nsample-leading),
         gfeat [1,ns,TS,DF] f32,
         w1x [XP,C1P] bf16, w1f [DF,C1P] bf16, b1 [1,C1P] f32,
         (w_l [Cp_{l-1},Cp_l] bf16, b_l [1,Cp_l] f32) * n_extra_layers,
         a_p [XP,DPP] bf16, a_h [DPP,DPP] bf16,
         o [1,TS,DPP] f32
    """
    def kernel(cxyz_ref, cfeat_ref, gxyz_ref, gfeat_ref, *refs):
        o_ref = refs[-1]
        a_h = refs[-2][...]
        a_p = refs[-3][...]
        w1x = refs[0][...]
        w1f = refs[1][...]
        b1 = refs[2][...]

        ns, TS = gxyz_ref.shape[1], gxyz_ref.shape[2]
        DPP = a_h.shape[0]

        def shared_mlp(x_xyz, x_feat):
            # layer 1: split weight (xyz rows / feature rows); BN scale pre-folded into w.
            h = jnp.dot(x_xyz.astype(jnp.bfloat16), w1x,
                        preferred_element_type=jnp.float32)
            h = h + jnp.dot(x_feat.astype(jnp.bfloat16), w1f,
                            preferred_element_type=jnp.float32)
            h = jnp.maximum(h + b1, 0.0)
            for l in range(n_extra_layers):
                w = refs[3 + 2 * l][...]
                b = refs[4 + 2 * l][...]
                h = jnp.dot(h.astype(jnp.bfloat16), w,
                            preferred_element_type=jnp.float32)
                h = jnp.maximum(h + b, 0.0)
            return h                                 # f32; pad lanes stay exactly zero

        cxyz = cxyz_ref[0]                                            # [TS, XP]
        cfeat = cfeat_ref[0]                                          # [TS, DF]
        gxyz = gxyz_ref[0].reshape(ns * TS, gxyz_ref.shape[3])        # [ns*TS, XP]
        gfeat = gfeat_ref[0].reshape(ns * TS, gfeat_ref.shape[3])     # [ns*TS, DF]

        h_c = shared_mlp(cxyz, cfeat)            # [TS, DPP]     center feature
        h_g = shared_mlp(gxyz, gfeat)            # [ns*TS, DPP]  grouped feature

        # e = leaky_relu([delta_p, delta_h] @ a) with delta_p = -grouped_xyz_norm
        #   = leaky_relu(h_c @ a_h  -  (h_g @ a_h + gxyz_norm @ a_p))
        u_c = jnp.dot(h_c.astype(jnp.bfloat16), a_h,
                      preferred_element_type=jnp.float32)             # [TS, DPP]
        v_g = jnp.dot(h_g.astype(jnp.bfloat16), a_h,
                      preferred_element_type=jnp.float32)
        v_g = v_g + jnp.dot(gxyz.astype(jnp.bfloat16), a_p,
                            preferred_element_type=jnp.float32)       # [ns*TS, DPP]
        v_g = v_g.reshape(ns, TS, DPP)
        h_g = h_g.reshape(ns, TS, DPP)

        def logits(j):
            e = u_c - v_g[j]
            return jnp.where(e > 0, e, alpha * e)

        # Online softmax over the nsample axis + weighted feature sum.
        # TODO(synk): dropout on the attention weights is identity (eval mode).
        m = logits(0)
        l_sum = jnp.ones((TS, DPP), jnp.float32)
        acc = h_g[0]
        for j in range(1, nsample):
            e = logits(j)
            m_new = jnp.maximum(m, e)
            corr = jnp.exp(m - m_new)
            p = jnp.exp(e - m_new)
            l_sum = corr * l_sum + p
            acc = corr * acc + p * h_g[j]
            m = m_new

        o_ref[0] = acc * pl.reciprocal(l_sum, approx=False)
    return kernel


def fused_mlp_gat(new_xyz, fps_feat, gxyz_norm_t, gfeat_t, mlp_params, a, *,
                  alpha, s_tile_cap=128):
    """new_xyz [B,S,3], fps_feat [B,S,D], gxyz_norm_t [B,ns,S,3], gfeat_t [B,ns,S,D]
       -> graph-pooled features [B, S, Dp] f32."""
    B, S, _ = new_xyz.shape
    ns = gxyz_norm_t.shape[1]
    D = fps_feat.shape[-1]

    XP = 8                          # xyz channel pad (3 -> 8)
    DF = _round_up(max(D, 1), 8)    # point-feature channel pad (small, NOT 128)

    # Fold the eval-mode BN scale into the conv weights; pad to TPU-friendly shapes.
    folded = [(w * scale[None, :], shift) for (w, scale, shift) in mlp_params]
    c_dims = [w.shape[1] for (w, _) in folded]
    c_pads = [_round_up(c, 128) for c in c_dims]
    Dp, DPP = c_dims[-1], c_pads[-1]

    w1, b1 = folded[0]
    C1, C1P = c_dims[0], c_pads[0]
    w1x = jnp.zeros((XP, C1P), jnp.bfloat16).at[:3, :C1].set(w1[:3].astype(jnp.bfloat16))
    w1f = jnp.zeros((DF, C1P), jnp.bfloat16).at[:D, :C1].set(w1[3:].astype(jnp.bfloat16))
    b1p = jnp.zeros((1, C1P), jnp.float32).at[:, :C1].set(b1.astype(jnp.float32))
    weight_args = [w1x, w1f, b1p]
    weight_specs = [pl.BlockSpec((XP, C1P), lambda b, s: (0, 0)),
                    pl.BlockSpec((DF, C1P), lambda b, s: (0, 0)),
                    pl.BlockSpec((1, C1P), lambda b, s: (0, 0))]

    prev_pad = C1P
    for l in range(1, len(folded)):
        w, bsh = folded[l]
        cin, cout = w.shape
        cpad = c_pads[l]
        wp = jnp.zeros((prev_pad, cpad), jnp.bfloat16).at[:cin, :cout].set(
            w.astype(jnp.bfloat16))
        bp = jnp.zeros((1, cpad), jnp.float32).at[:, :cout].set(bsh.astype(jnp.float32))
        weight_args += [wp, bp]
        weight_specs += [pl.BlockSpec((prev_pad, cpad), lambda b, s: (0, 0)),
                         pl.BlockSpec((1, cpad), lambda b, s: (0, 0))]
        prev_pad = cpad

    # Attention matrix split so [delta_p, delta_h] never has to be concatenated.
    a_p = jnp.zeros((XP, DPP), jnp.bfloat16).at[:3, :Dp].set(a[:3].astype(jnp.bfloat16))
    a_h = jnp.zeros((DPP, DPP), jnp.bfloat16).at[:Dp, :Dp].set(a[3:].astype(jnp.bfloat16))
    weight_args += [a_p, a_h]
    weight_specs += [pl.BlockSpec((XP, DPP), lambda b, s: (0, 0)),
                     pl.BlockSpec((DPP, DPP), lambda b, s: (0, 0))]

    # Center-tile size: capped at 128 and shrunk so in-kernel [ns*TS, DPP] f32
    # intermediates stay well inside the v7x 64 MiB (32 MiB scoped) VMEM budget.
    TS = min(s_tile_cap, _round_up(S, 8))
    while TS > 8 and 3 * ns * TS * DPP * 4 > 6 * 1024 * 1024:
        TS //= 2
    TS = max(8, (TS // 8) * 8)
    S_pad = _round_up(S, TS)

    cxyz = jnp.pad(new_xyz.astype(jnp.float32), ((0, 0), (0, S_pad - S), (0, XP - 3)))
    cfeat = jnp.pad(fps_feat.astype(jnp.float32), ((0, 0), (0, S_pad - S), (0, DF - D)))
    gxyz = jnp.pad(gxyz_norm_t.astype(jnp.float32),
                   ((0, 0), (0, 0), (0, S_pad - S), (0, XP - 3)))
    gfeat = jnp.pad(gfeat_t.astype(jnp.float32),
                    ((0, 0), (0, 0), (0, S_pad - S), (0, DF - D)))

    kernel = _make_fused_kernel(len(folded) - 1, ns, float(alpha))
    out = pl.pallas_call(
        kernel,
        out_shape=jax.ShapeDtypeStruct((B, S_pad, DPP), jnp.float32),
        grid=(B, S_pad // TS),
        in_specs=[pl.BlockSpec((1, TS, XP), lambda b, s: (b, s, 0)),
                  pl.BlockSpec((1, TS, DF), lambda b, s: (b, s, 0)),
                  pl.BlockSpec((1, ns, TS, XP), lambda b, s: (b, 0, s, 0)),
                  pl.BlockSpec((1, ns, TS, DF), lambda b, s: (b, 0, s, 0))] + weight_specs,
        out_specs=pl.BlockSpec((1, TS, DPP), lambda b, s: (b, s, 0)),
        compiler_params=pltpu.CompilerParams(
            dimension_semantics=("parallel", "parallel"),
            vmem_limit_bytes=32 * 1024 * 1024),
    )(cxyz, cfeat, gxyz, gfeat, *weight_args)
    return out[:, :S, :Dp]


# ----------------------------------------------------------------------------
# Plain-JAX glue (sampling / grouping, same semantics as the torch helpers)
# ----------------------------------------------------------------------------

def index_points(points, idx):
    # points [B, N, C], idx [B, ...] -> [B, ..., C]
    return jax.vmap(lambda p, i: p[i])(points, idx)


def square_distance(src, dst):
    dist = -2.0 * jnp.einsum("bnc,bmc->bnm", src, dst)
    dist = dist + jnp.sum(src ** 2, -1)[:, :, None]
    dist = dist + jnp.sum(dst ** 2, -1)[:, None, :]
    return dist


def farthest_point_sample(xyz, npoint):
    B, N, _ = xyz.shape

    def body(i, state):
        centroids, distance, farthest = state
        centroids = centroids.at[:, i].set(farthest)
        centroid = jax.vmap(lambda p, f: p[f])(xyz, farthest)[:, None, :]   # [B,1,3]
        dist = jnp.sum((xyz - centroid) ** 2, -1)
        distance = jnp.minimum(distance, dist)
        farthest = jnp.argmax(distance, axis=-1).astype(jnp.int32)
        return centroids, distance, farthest

    centroids = jnp.zeros((B, npoint), dtype=jnp.int32)
    distance = jnp.full((B, N), 1e10, dtype=jnp.float32)
    farthest = jnp.zeros((B,), dtype=jnp.int32)   # deterministic start (torch uses randint)
    centroids, _, _ = jax.lax.fori_loop(0, npoint, body, (centroids, distance, farthest))
    return centroids


def query_ball_point(radius, nsample, xyz, new_xyz):
    B, N, _ = xyz.shape
    S = new_xyz.shape[1]
    sqrdists = square_distance(new_xyz, xyz)                     # [B,S,N]
    group_idx = jnp.broadcast_to(jnp.arange(N, dtype=jnp.int32), (B, S, N))
    group_idx = jnp.where(sqrdists > radius ** 2, N, group_idx)
    group_idx = jnp.sort(group_idx, axis=-1)[:, :, :nsample]
    group_first = jnp.broadcast_to(group_idx[:, :, :1], (B, S, nsample))
    group_idx = jnp.where(group_idx == N, group_first, group_idx)
    return group_idx


# ----------------------------------------------------------------------------
# Module forward
# ----------------------------------------------------------------------------

def graph_attention_conv_layer(xyz_bcn, points_bdn, params, *, npoint, radius,
                               nsample, alpha):
    """Forward of GraphAttentionConvLayer (group_all=False, eval mode).

    xyz_bcn:    [B, 3, N]  (torch channel-first)
    points_bdn: [B, D, N]
    Returns (new_xyz [B, 3, S], new_points [B, Dp, S]).
    """
    xyz = jnp.transpose(xyz_bcn, (0, 2, 1))        # [B, N, 3]
    points = jnp.transpose(points_bdn, (0, 2, 1))  # [B, N, D]

    # --- sample_and_group ---
    fps_idx = farthest_point_sample(xyz, npoint)                 # [B,S]
    new_xyz = index_points(xyz, fps_idx)                         # [B,S,3]
    idx = query_ball_point(radius, nsample, xyz, new_xyz)        # [B,S,ns]
    idx_t = jnp.transpose(idx, (0, 2, 1))                        # [B,ns,S]  nsample-leading
    grouped_xyz_t = index_points(xyz, idx_t)                     # [B,ns,S,3]
    gxyz_norm_t = grouped_xyz_t - new_xyz[:, None, :, :]         # [B,ns,S,3]
    gfeat_t = index_points(points, idx_t)                        # [B,ns,S,D]
    fps_feat = index_points(points, fps_idx)                     # [B,S,D]

    # --- fused shared MLP + graph attention (single Pallas kernel) ---
    pooled = fused_mlp_gat(new_xyz, fps_feat, gxyz_norm_t, gfeat_t,
                           params["mlp"], params["a"], alpha=alpha)   # [B,S,Dp]

    new_xyz_out = jnp.transpose(new_xyz, (0, 2, 1))        # [B,3,S]
    new_points_out = jnp.transpose(pooled, (0, 2, 1))      # [B,Dp,S]
    return new_xyz_out, new_points_out


# ----------------------------------------------------------------------------
# Deterministic parameter init (matches __init__ shapes of the torch module)
# ----------------------------------------------------------------------------

def init_params(key, in_channel, mlp):
    eps = 1e-5
    params = {"mlp": []}
    last = in_channel
    for out in mlp:
        key, kw, kb = jax.random.split(key, 3)
        bound = 1.0 / (last ** 0.5)                      # kaiming_uniform(a=sqrt(5)) bound (1x1 conv)
        w = jax.random.uniform(kw, (last, out), jnp.float32, -bound, bound)   # Conv2d weight.T
        b = jax.random.uniform(kb, (out,), jnp.float32, -bound, bound)        # Conv2d bias
        gamma = jnp.ones((out,), jnp.float32)            # BN weight (default init)
        beta = jnp.zeros((out,), jnp.float32)            # BN bias
        scale = gamma / jnp.sqrt(1.0 + eps)              # eval BN: running_mean=0, running_var=1
        shift = beta + scale * b                         # fold conv bias into BN shift
        params["mlp"].append((w, scale, shift))
        last = out
    # GraphAttention.a: xavier_uniform_(gain=1.414), shape (3 + last, last)
    key, ka = jax.random.split(key)
    A = 3 + last
    limit = 1.414 * (6.0 / (A + last)) ** 0.5
    params["a"] = jax.random.uniform(ka, (A, last), jnp.float32, -limit, limit)
    return params


# ----------------------------------------------------------------------------
if __name__ == "__main__":
    key = jax.random.PRNGKey(0)
    k_xyz, k_pts, k_par = jax.random.split(key, 3)

    # Small, shape-consistent configuration
    B, N, D = 2, 64, 6
    npoint, radius, nsample = 16, 0.8, 8
    in_channel = 3 + D            # concat of xyz(3) and point features(D)
    mlp = [32, 64]
    alpha = 0.2                   # LeakyReLU slope
    # droupout = 0.6 -> identity in eval mode

    xyz = jax.random.normal(k_xyz, (B, 3, N), jnp.float32)
    points = jax.random.normal(k_pts, (B, D, N), jnp.float32)
    params = init_params(k_par, in_channel, mlp)

    fwd = jax.jit(functools.partial(graph_attention_conv_layer,
                                    npoint=npoint, radius=radius,
                                    nsample=nsample, alpha=alpha))
    new_xyz, new_points = fwd(xyz, points, params)
    jax.block_until_ready((new_xyz, new_points))

    assert new_xyz.shape == (B, 3, npoint)
    assert new_points.shape == (B, mlp[-1], npoint)
    assert bool(jnp.all(jnp.isfinite(new_points)))
    print("KERNEL_OK")
</pallas_src>

<mosaic_0001>
module attributes {stable_mosaic.version = 11 : i64} {
  func.func @kernel(%arg0: i32, %arg1: i32, %arg2: memref<1x16x8xf32, #tpu.memory_space<vmem>>, %arg3: memref<1x16x8xf32, #tpu.memory_space<vmem>>, %arg4: memref<1x8x16x8xf32, #tpu.memory_space<vmem>>, %arg5: memref<1x8x16x8xf32, #tpu.memory_space<vmem>>, %arg6: memref<8x128xbf16, #tpu.memory_space<vmem>>, %arg7: memref<8x128xbf16, #tpu.memory_space<vmem>>, %arg8: memref<1x128xf32, #tpu.memory_space<vmem>>, %arg9: memref<128x128xbf16, #tpu.memory_space<vmem>>, %arg10: memref<1x128xf32, #tpu.memory_space<vmem>>, %arg11: memref<8x128xbf16, #tpu.memory_space<vmem>>, %arg12: memref<128x128xbf16, #tpu.memory_space<vmem>>, %arg13: memref<1x16x128xf32, #tpu.memory_space<vmem>>) attributes {dimension_semantics = [#tpu.dimension_semantics<parallel>, #tpu.dimension_semantics<parallel>], iteration_bounds = array<i64: 2, 1>, scalar_prefetch = 0 : i64, scratch_operands = 0 : i64, tpu.core_type = #tpu.core_type<tc>, window_params = [{transform_indices = @transform_0, window_bounds = array<i64: 1, 16, 8>}, {transform_indices = @transform_1, window_bounds = array<i64: 1, 16, 8>}, {transform_indices = @transform_2, window_bounds = array<i64: 1, 8, 16, 8>}, {transform_indices = @transform_3, window_bounds = array<i64: 1, 8, 16, 8>}, {pipeline_mode = #tpu.pipeline_mode<synchronous>, transform_indices = @transform_4, window_bounds = array<i64: 8, 128>}, {pipeline_mode = #tpu.pipeline_mode<synchronous>, transform_indices = @transform_5, window_bounds = array<i64: 8, 128>}, {pipeline_mode = #tpu.pipeline_mode<synchronous>, transform_indices = @transform_6, window_bounds = array<i64: 1, 128>}, {pipeline_mode = #tpu.pipeline_mode<synchronous>, transform_indices = @transform_7, window_bounds = array<i64: 128, 128>}, {pipeline_mode = #tpu.pipeline_mode<synchronous>, transform_indices = @transform_8, window_bounds = array<i64: 1, 128>}, {pipeline_mode = #tpu.pipeline_mode<synchronous>, transform_indices = @transform_9, window_bounds = array<i64: 8, 128>}, {pipeline_mode = #tpu.pipeline_mode<synchronous>, transform_indices = @transform_10, window_bounds = array<i64: 128, 128>}, {transform_indices = @transform_11, window_bounds = array<i64: 1, 16, 128>}]} {
    %c0 = arith.constant 0 : index
    %c0_0 = arith.constant 0 : index
    %0 = vector.load %arg12[%c0, %c0_0] : memref<128x128xbf16, #tpu.memory_space<vmem>>, vector<128x128xbf16>
    %c0_1 = arith.constant 0 : index
    %c0_2 = arith.constant 0 : index
    %1 = vector.load %arg11[%c0_1, %c0_2] : memref<8x128xbf16, #tpu.memory_space<vmem>>, vector<8x128xbf16>
    %c0_3 = arith.constant 0 : index
    %c0_4 = arith.constant 0 : index
    %2 = vector.load %arg6[%c0_3, %c0_4] : memref<8x128xbf16, #tpu.memory_space<vmem>>, vector<8x128xbf16>
    %c0_5 = arith.constant 0 : index
    %c0_6 = arith.constant 0 : index
    %3 = vector.load %arg7[%c0_5, %c0_6] : memref<8x128xbf16, #tpu.memory_space<vmem>>, vector<8x128xbf16>
    %c0_7 = arith.constant 0 : index
    %c0_8 = arith.constant 0 : index
    %4 = vector.load %arg8[%c0_7, %c0_8] : memref<1x128xf32, #tpu.memory_space<vmem>>, vector<1x128xf32>
    %c0_9 = arith.constant 0 : index
    %c0_10 = arith.constant 0 : index
    %c0_11 = arith.constant 0 : index
    %5 = vector.load %arg2[%c0_9, %c0_10, %c0_11] : memref<1x16x8xf32, #tpu.memory_space<vmem>>, vector<1x16x8xf32>
    %6 = vector.shape_cast %5 : vector<1x16x8xf32> to vector<16x8xf32>
    %c0_12 = arith.constant 0 : index
    %c0_13 = arith.constant 0 : index
    %c0_14 = arith.constant 0 : index
    %7 = vector.load %arg3[%c0_12, %c0_13, %c0_14] : memref<1x16x8xf32, #tpu.memory_space<vmem>>, vector<1x16x8xf32>
    %8 = vector.shape_cast %7 : vector<1x16x8xf32> to vector<16x8xf32>
    %c0_15 = arith.constant 0 : index
    %c0_16 = arith.constant 0 : index
    %c0_17 = arith.constant 0 : index
    %c0_18 = arith.constant 0 : index
    %9 = vector.load %arg4[%c0_15, %c0_16, %c0_17, %c0_18] : memref<1x8x16x8xf32, #tpu.memory_space<vmem>>, vector<1x8x16x8xf32>
    %10 = vector.shape_cast %9 : vector<1x8x16x8xf32> to vector<8x16x8xf32>
    %11 = vector.shape_cast %10 : vector<8x16x8xf32> to vector<128x8xf32>
    %c0_19 = arith.constant 0 : index
    %c0_20 = arith.constant 0 : index
    %c0_21 = arith.constant 0 : index
    %c0_22 = arith.constant 0 : index
    %12 = vector.load %arg5[%c0_19, %c0_20, %c0_21, %c0_22] : memref<1x8x16x8xf32, #tpu.memory_space<vmem>>, vector<1x8x16x8xf32>
    %13 = vector.shape_cast %12 : vector<1x8x16x8xf32> to vector<8x16x8xf32>
    %14 = vector.shape_cast %13 : vector<8x16x8xf32> to vector<128x8xf32>
    %15 = arith.truncf %6 : vector<16x8xf32> to vector<16x8xbf16>
    %cst = arith.constant dense<0.000000e+00> : vector<16x128xf32>
    %16 = tpu.matmul %15, %2, %cst {dimension_numbers = #tpu.dot_dimension_numbers<[1], [0], [0], [1], [0, 0, 1, 1], [], []>} : vector<16x8xbf16>, vector<8x128xbf16>, vector<16x128xf32> -> vector<16x128xf32>
    %17 = arith.truncf %8 : vector<16x8xf32> to vector<16x8xbf16>
    %cst_23 = arith.constant dense<0.000000e+00> : vector<16x128xf32>
    %18 = tpu.matmul %17, %3, %cst_23 {dimension_numbers = #tpu.dot_dimension_numbers<[1], [0], [0], [1], [0, 0, 1, 1], [], []>} : vector<16x8xbf16>, vector<8x128xbf16>, vector<16x128xf32> -> vector<16x128xf32>
    %19 = arith.addf %16, %18 : vector<16x128xf32>
    %20 = vector.broadcast %4 : vector<1x128xf32> to vector<16x128xf32>
    %21 = arith.addf %19, %20 : vector<16x128xf32>
    %cst_24 = arith.constant 0.000000e+00 : f32
    %22 = vector.broadcast %cst_24 : f32 to vector<16x128xf32>
    %23 = arith.maximumf %21, %22 : vector<16x128xf32>
    %c0_25 = arith.constant 0 : index
    %c0_26 = arith.constant 0 : index
    %24 = vector.load %arg9[%c0_25, %c0_26] : memref<128x128xbf16, #tpu.memory_space<vmem>>, vector<128x128xbf16>
    %c0_27 = arith.constant 0 : index
    %c0_28 = arith.constant 0 : index
    %25 = vector.load %arg10[%c0_27, %c0_28] : memref<1x128xf32, #tpu.memory_space<vmem>>, vector<1x128xf32>
    %26 = arith.truncf %23 : vector<16x128xf32> to vector<16x128xbf16>
    %cst_29 = arith.constant dense<0.000000e+00> : vector<16x128xf32>
    %27 = tpu.matmul %26, %24, %cst_29 {dimension_numbers = #tpu.dot_dimension_numbers<[1], [0], [0], [1], [0, 0, 1, 1], [], []>} : vector<16x128xbf16>, vector<128x128xbf16>, vector<16x128xf32> -> vector<16x128xf32>
    %28 = vector.broadcast %25 : vector<1x128xf32> to vector<16x128xf32>
    %29 = arith.addf %27, %28 : vector<16x128xf32>
    %cst_30 = arith.constant 0.000000e+00 : f32
    %30 = vector.broadcast %cst_30 : f32 to vector<16x128xf32>
    %31 = arith.maximumf %29, %30 : vector<16x128xf32>
    %32 = arith.truncf %11 : vector<128x8xf32> to vector<128x8xbf16>
    %cst_31 = arith.constant dense<0.000000e+00> : vector<128x128xf32>
    %33 = tpu.matmul %32, %2, %cst_31 {dimension_numbers = #tpu.dot_dimension_numbers<[1], [0], [0], [1], [0, 0, 1, 1], [], []>} : vector<128x8xbf16>, vector<8x128xbf16>, vector<128x128xf32> -> vector<128x128xf32>
    %34 = arith.truncf %14 : vector<128x8xf32> to vector<128x8xbf16>
    %cst_32 = arith.constant dense<0.000000e+00> : vector<128x128xf32>
    %35 = tpu.matmul %34, %3, %cst_32 {dimension_numbers = #tpu.dot_dimension_numbers<[1], [0], [0], [1], [0, 0, 1, 1], [], []>} : vector<128x8xbf16>, vector<8x128xbf16>, vector<128x128xf32> -> vector<128x128xf32>
    %36 = arith.addf %33, %35 : vector<128x128xf32>
    %37 = vector.broadcast %4 : vector<1x128xf32> to vector<128x128xf32>
    %38 = arith.addf %36, %37 : vector<128x128xf32>
    %cst_33 = arith.constant 0.000000e+00 : f32
    %39 = vector.broadcast %cst_33 : f32 to vector<128x128xf32>
    %40 = arith.maximumf %38, %39 : vector<128x128xf32>
    %c0_34 = arith.constant 0 : index
    %c0_35 = arith.constant 0 : index
    %41 = vector.load %arg9[%c0_34, %c0_35] : memref<128x128xbf16, #tpu.memory_space<vmem>>, vector<128x128xbf16>
    %c0_36 = arith.constant 0 : index
    %c0_37 = arith.constant 0 : index
    %42 = vector.load %arg10[%c0_36, %c0_37] : memref<1x128xf32, #tpu.memory_space<vmem>>, vector<1x128xf32>
    %43 = arith.truncf %40 : vector<128x128xf32> to vector<128x128xbf16>
    %cst_38 = arith.constant dense<0.000000e+00> : vector<128x128xf32>
    %44 = tpu.matmul %43, %41, %cst_38 {dimension_numbers = #tpu.dot_dimension_numbers<[1], [0], [0], [1], [0, 0, 1, 1], [], []>} : vector<128x128xbf16>, vector<128x128xbf16>, vector<128x128xf32> -> vector<128x128xf32>
    %45 = vector.broadcast %42 : vector<1x128xf32> to vector<128x128xf32>
    %46 = arith.addf %44, %45 : vector<128x128xf32>
    %cst_39 = arith.constant 0.000000e+00 : f32
    %47 = vector.broadcast %cst_39 : f32 to vector<128x128xf32>
    %48 = arith.maximumf %46, %47 : vector<128x128xf32>
    %49 = arith.truncf %31 : vector<16x128xf32> to vector<16x128xbf16>
    %cst_40 = arith.constant dense<0.000000e+00> : vector<16x128xf32>
    %50 = tpu.matmul %49, %0, %cst_40 {dimension_numbers = #tpu.dot_dimension_numbers<[1], [0], [0], [1], [0, 0, 1, 1], [], []>} : vector<16x128xbf16>, vector<128x128xbf16>, vector<16x128xf32> -> vector<16x128xf32>
    %51 = arith.truncf %48 : vector<128x128xf32> to vector<128x128xbf16>
    %cst_41 = arith.constant dense<0.000000e+00> : vector<128x128xf32>
    %52 = tpu.matmul %51, %0, %cst_41 {dimension_numbers = #tpu.dot_dimension_numbers<[1], [0], [0], [1], [0, 0, 1, 1], [], []>} : vector<128x128xbf16>, vector<128x128xbf16>, vector<128x128xf32> -> vector<128x128xf32>
    %53 = arith.truncf %11 : vector<128x8xf32> to vector<128x8xbf16>
    %cst_42 = arith.constant dense<0.000000e+00> : vector<128x128xf32>
    %54 = tpu.matmul %53, %1, %cst_42 {dimension_numbers = #tpu.dot_dimension_numbers<[1], [0], [0], [1], [0, 0, 1, 1], [], []>} : vector<128x8xbf16>, vector<8x128xbf16>, vector<128x128xf32> -> vector<128x128xf32>
    %55 = arith.addf %52, %54 : vector<128x128xf32>
    %56 = vector.shape_cast %55 : vector<128x128xf32> to vector<8x16x128xf32>
    %57 = vector.shape_cast %48 : vector<128x128xf32> to vector<8x16x128xf32>
    %58 = vector.extract_strided_slice %56 {offsets = [0, 0, 0], sizes = [1, 16, 128], strides = [1, 1, 1]} : vector<8x16x128xf32> to vector<1x16x128xf32>
    %59 = vector.shape_cast %58 : vector<1x16x128xf32> to vector<16x128xf32>
    %60 = arith.subf %50, %59 : vector<16x128xf32>
    %cst_43 = arith.constant 0.000000e+00 : f32
    %61 = vector.broadcast %cst_43 : f32 to vector<16x128xf32>
    %62 = arith.cmpf ogt, %60, %61 : vector<16x128xf32>
    %cst_44 = arith.constant 2.000000e-01 : f32
    %63 = vector.broadcast %cst_44 : f32 to vector<16x128xf32>
    %64 = arith.mulf %63, %60 : vector<16x128xf32>
    %65 = arith.select %62, %60, %64 : vector<16x128xi1>, vector<16x128xf32>
    %cst_45 = arith.constant 1.000000e+00 : f32
    %66 = vector.broadcast %cst_45 : f32 to vector<16x128xf32>
    %67 = vector.extract_strided_slice %57 {offsets = [0, 0, 0], sizes = [1, 16, 128], strides = [1, 1, 1]} : vector<8x16x128xf32> to vector<1x16x128xf32>
    %68 = vector.shape_cast %67 : vector<1x16x128xf32> to vector<16x128xf32>
    %69 = vector.extract_strided_slice %56 {offsets = [1, 0, 0], sizes = [1, 16, 128], strides = [1, 1, 1]} : vector<8x16x128xf32> to vector<1x16x128xf32>
    %70 = vector.shape_cast %69 : vector<1x16x128xf32> to vector<16x128xf32>
    %71 = arith.subf %50, %70 : vector<16x128xf32>
    %cst_46 = arith.constant 0.000000e+00 : f32
    %72 = vector.broadcast %cst_46 : f32 to vector<16x128xf32>
    %73 = arith.cmpf ogt, %71, %72 : vector<16x128xf32>
    %cst_47 = arith.constant 2.000000e-01 : f32
    %74 = vector.broadcast %cst_47 : f32 to vector<16x128xf32>
    %75 = arith.mulf %74, %71 : vector<16x128xf32>
    %76 = arith.select %73, %71, %75 : vector<16x128xi1>, vector<16x128xf32>
    %77 = arith.maximumf %65, %76 : vector<16x128xf32>
    %78 = arith.subf %65, %77 : vector<16x128xf32>
    %79 = math.exp %78 : vector<16x128xf32>
    %80 = arith.subf %76, %77 : vector<16x128xf32>
    %81 = math.exp %80 : vector<16x128xf32>
    %82 = arith.mulf %79, %66 : vector<16x128xf32>
    %83 = arith.addf %82, %81 : vector<16x128xf32>
    %84 = arith.mulf %79, %68 : vector<16x128xf32>
    %85 = vector.extract_strided_slice %57 {offsets = [1, 0, 0], sizes = [1, 16, 128], strides = [1, 1, 1]} : vector<8x16x128xf32> to vector<1x16x128xf32>
    %86 = vector.shape_cast %85 : vector<1x16x128xf32> to vector<16x128xf32>
    %87 = arith.mulf %81, %86 : vector<16x128xf32>
    %88 = arith.addf %84, %87 : vector<16x128xf32>
    %89 = vector.extract_strided_slice %56 {offsets = [2, 0, 0], sizes = [1, 16, 128], strides = [1, 1, 1]} : vector<8x16x128xf32> to vector<1x16x128xf32>
    %90 = vector.shape_cast %89 : vector<1x16x128xf32> to vector<16x128xf32>
    %91 = arith.subf %50, %90 : vector<16x128xf32>
    %cst_48 = arith.constant 0.000000e+00 : f32
    %92 = vector.broadcast %cst_48 : f32 to vector<16x128xf32>
    %93 = arith.cmpf ogt, %91, %92 : vector<16x128xf32>
    %cst_49 = arith.constant 2.000000e-01 : f32
    %94 = vector.broadcast %cst_49 : f32 to vector<16x128xf32>
    %95 = arith.mulf %94, %91 : vector<16x128xf32>
    %96 = arith.select %93, %91, %95 : vector<16x128xi1>, vector<16x128xf32>
    %97 = arith.maximumf %77, %96 : vector<16x128xf32>
    %98 = arith.subf %77, %97 : vector<16x128xf32>
    %99 = math.exp %98 : vector<16x128xf32>
    %100 = arith.subf %96, %97 : vector<16x128xf32>
    %101 = math.exp %100 : vector<16x128xf32>
    %102 = arith.mulf %99, %83 : vector<16x128xf32>
    %103 = arith.addf %102, %101 : vector<16x128xf32>
    %104 = arith.mulf %99, %88 : vector<16x128xf32>
    %105 = vector.extract_strided_slice %57 {offsets = [2, 0, 0], sizes = [1, 16, 128], strides = [1, 1, 1]} : vector<8x16x128xf32> to vector<1x16x128xf32>
    %106 = vector.shape_cast %105 : vector<1x16x128xf32> to vector<16x128xf32>
    %107 = arith.mulf %101, %106 : vector<16x128xf32>
    %108 = arith.addf %104, %107 : vector<16x128xf32>
    %109 = vector.extract_strided_slice %56 {offsets = [3, 0, 0], sizes = [1, 16, 128], strides = [1, 1, 1]} : vector<8x16x128xf32> to vector<1x16x128xf32>
    %110 = vector.shape_cast %109 : vector<1x16x128xf32> to vector<16x128xf32>
    %111 = arith.subf %50, %110 : vector<16x128xf32>
    %cst_50 = arith.constant 0.000000e+00 : f32
    %112 = vector.broadcast %cst_50 : f32 to vector<16x128xf32>
    %113 = arith.cmpf ogt, %111, %112 : vector<16x128xf32>
    %cst_51 = arith.constant 2.000000e-01 : f32
    %114 = vector.broadcast %cst_51 : f32 to vector<16x128xf32>
    %115 = arith.mulf %114, %111 : vector<16x128xf32>
    %116 = arith.select %113, %111, %115 : vector<16x128xi1>, vector<16x128xf32>
    %117 = arith.maximumf %97, %116 : vector<16x128xf32>
    %118 = arith.subf %97, %117 : vector<16x128xf32>
    %119 = math.exp %118 : vector<16x128xf32>
    %120 = arith.subf %116, %117 : vector<16x128xf32>
    %121 = math.exp %120 : vector<16x128xf32>
    %122 = arith.mulf %119, %103 : vector<16x128xf32>
    %123 = arith.addf %122, %121 : vector<16x128xf32>
    %124 = arith.mulf %119, %108 : vector<16x128xf32>
    %125 = vector.extract_strided_slice %57 {offsets = [3, 0, 0], sizes = [1, 16, 128], strides = [1, 1, 1]} : vector<8x16x128xf32> to vector<1x16x128xf32>
    %126 = vector.shape_cast %125 : vector<1x16x128xf32> to vector<16x128xf32>
    %127 = arith.mulf %121, %126 : vector<16x128xf32>
    %128 = arith.addf %124, %127 : vector<16x128xf32>
    %129 = vector.extract_strided_slice %56 {offsets = [4, 0, 0], sizes = [1, 16, 128], strides = [1, 1, 1]} : vector<8x16x128xf32> to vector<1x16x128xf32>
    %130 = vector.shape_cast %129 : vector<1x16x128xf32> to vector<16x128xf32>
    %131 = arith.subf %50, %130 : vector<16x128xf32>
    %cst_52 = arith.constant 0.000000e+00 : f32
    %132 = vector.broadcast %cst_52 : f32 to vector<16x128xf32>
    %133 = arith.cmpf ogt, %131, %132 : vector<16x128xf32>
    %cst_53 = arith.constant 2.000000e-01 : f32
    %134 = vector.broadcast %cst_53 : f32 to vector<16x128xf32>
    %135 = arith.mulf %134, %131 : vector<16x128xf32>
    %136 = arith.select %133, %131, %135 : vector<16x128xi1>, vector<16x128xf32>
    %137 = arith.maximumf %117, %136 : vector<16x128xf32>
    %138 = arith.subf %117, %137 : vector<16x128xf32>
    %139 = math.exp %138 : vector<16x128xf32>
    %140 = arith.subf %136, %137 : vector<16x128xf32>
    %141 = math.exp %140 : vector<16x128xf32>
    %142 = arith.mulf %139, %123 : vector<16x128xf32>
    %143 = arith.addf %142, %141 : vector<16x128xf32>
    %144 = arith.mulf %139, %128 : vector<16x128xf32>
    %145 = vector.extract_strided_slice %57 {offsets = [4, 0, 0], sizes = [1, 16, 128], strides = [1, 1, 1]} : vector<8x16x128xf32> to vector<1x16x128xf32>
    %146 = vector.shape_cast %145 : vector<1x16x128xf32> to vector<16x128xf32>
    %147 = arith.mulf %141, %146 : vector<16x128xf32>
    %148 = arith.addf %144, %147 : vector<16x128xf32>
    %149 = vector.extract_strided_slice %56 {offsets = [5, 0, 0], sizes = [1, 16, 128], strides = [1, 1, 1]} : vector<8x16x128xf32> to vector<1x16x128xf32>
    %150 = vector.shape_cast %149 : vector<1x16x128xf32> to vector<16x128xf32>
    %151 = arith.subf %50, %150 : vector<16x128xf32>
    %cst_54 = arith.constant 0.000000e+00 : f32
    %152 = vector.broadcast %cst_54 : f32 to vector<16x128xf32>
    %153 = arith.cmpf ogt, %151, %152 : vector<16x128xf32>
    %cst_55 = arith.constant 2.000000e-01 : f32
    %154 = vector.broadcast %cst_55 : f32 to vector<16x128xf32>
    %155 = arith.mulf %154, %151 : vector<16x128xf32>
    %156 = arith.select %153, %151, %155 : vector<16x128xi1>, vector<16x128xf32>
    %157 = arith.maximumf %137, %156 : vector<16x128xf32>
    %158 = arith.subf %137, %157 : vector<16x128xf32>
    %159 = math.exp %158 : vector<16x128xf32>
    %160 = arith.subf %156, %157 : vector<16x128xf32>
    %161 = math.exp %160 : vector<16x128xf32>
    %162 = arith.mulf %159, %143 : vector<16x128xf32>
    %163 = arith.addf %162, %161 : vector<16x128xf32>
    %164 = arith.mulf %159, %148 : vector<16x128xf32>
    %165 = vector.extract_strided_slice %57 {offsets = [5, 0, 0], sizes = [1, 16, 128], strides = [1, 1, 1]} : vector<8x16x128xf32> to vector<1x16x128xf32>
    %166 = vector.shape_cast %165 : vector<1x16x128xf32> to vector<16x128xf32>
    %167 = arith.mulf %161, %166 : vector<16x128xf32>
    %168 = arith.addf %164, %167 : vector<16x128xf32>
    %169 = vector.extract_strided_slice %56 {offsets = [6, 0, 0], sizes = [1, 16, 128], strides = [1, 1, 1]} : vector<8x16x128xf32> to vector<1x16x128xf32>
    %170 = vector.shape_cast %169 : vector<1x16x128xf32> to vector<16x128xf32>
    %171 = arith.subf %50, %170 : vector<16x128xf32>
    %cst_56 = arith.constant 0.000000e+00 : f32
    %172 = vector.broadcast %cst_56 : f32 to vector<16x128xf32>
    %173 = arith.cmpf ogt, %171, %172 : vector<16x128xf32>
    %cst_57 = arith.constant 2.000000e-01 : f32
    %174 = vector.broadcast %cst_57 : f32 to vector<16x128xf32>
    %175 = arith.mulf %174, %171 : vector<16x128xf32>
    %176 = arith.select %173, %171, %175 : vector<16x128xi1>, vector<16x128xf32>
    %177 = arith.maximumf %157, %176 : vector<16x128xf32>
    %178 = arith.subf %157, %177 : vector<16x128xf32>
    %179 = math.exp %178 : vector<16x128xf32>
    %180 = arith.subf %176, %177 : vector<16x128xf32>
    %181 = math.exp %180 : vector<16x128xf32>
    %182 = arith.mulf %179, %163 : vector<16x128xf32>
    %183 = arith.addf %182, %181 : vector<16x128xf32>
    %184 = arith.mulf %179, %168 : vector<16x128xf32>
    %185 = vector.extract_strided_slice %57 {offsets = [6, 0, 0], sizes = [1, 16, 128], strides = [1, 1, 1]} : vector<8x16x128xf32> to vector<1x16x128xf32>
    %186 = vector.shape_cast %185 : vector<1x16x128xf32> to vector<16x128xf32>
    %187 = arith.mulf %181, %186 : vector<16x128xf32>
    %188 = arith.addf %184, %187 : vector<16x128xf32>
    %189 = vector.extract_strided_slice %56 {offsets = [7, 0, 0], sizes = [1, 16, 128], strides = [1, 1, 1]} : vector<8x16x128xf32> to vector<1x16x128xf32>
    %190 = vector.shape_cast %189 : vector<1x16x128xf32> to vector<16x128xf32>
    %191 = arith.subf %50, %190 : vector<16x128xf32>
    %cst_58 = arith.constant 0.000000e+00 : f32
    %192 = vector.broadcast %cst_58 : f32 to vector<16x128xf32>
    %193 = arith.cmpf ogt, %191, %192 : vector<16x128xf32>
    %cst_59 = arith.constant 2.000000e-01 : f32
    %194 = vector.broadcast %cst_59 : f32 to vector<16x128xf32>
    %195 = arith.mulf %194, %191 : vector<16x128xf32>
    %196 = arith.select %193, %191, %195 : vector<16x128xi1>, vector<16x128xf32>
    %197 = arith.maximumf %177, %196 : vector<16x128xf32>
    %198 = arith.subf %177, %197 : vector<16x128xf32>
    %199 = math.exp %198 : vector<16x128xf32>
    %200 = arith.subf %196, %197 : vector<16x128xf32>
    %201 = math.exp %200 : vector<16x128xf32>
    %202 = arith.mulf %199, %183 : vector<16x128xf32>
    %203 = arith.addf %202, %201 : vector<16x128xf32>
    %204 = arith.mulf %199, %188 : vector<16x128xf32>
    %205 = vector.extract_strided_slice %57 {offsets = [7, 0, 0], sizes = [1, 16, 128], strides = [1, 1, 1]} : vector<8x16x128xf32> to vector<1x16x128xf32>
    %206 = vector.shape_cast %205 : vector<1x16x128xf32> to vector<16x128xf32>
    %207 = arith.mulf %201, %206 : vector<16x128xf32>
    %208 = arith.addf %204, %207 : vector<16x128xf32>
    %209 = tpu.reciprocal %203 : vector<16x128xf32> -> vector<16x128xf32>
    %210 = arith.mulf %208, %209 : vector<16x128xf32>
    %c0_60 = arith.constant 0 : index
    %c0_61 = arith.constant 0 : index
    %c0_62 = arith.constant 0 : index
    %211 = vector.load %arg13[%c0_60, %c0_61, %c0_62] : memref<1x16x128xf32, #tpu.memory_space<vmem>>, vector<1x16x128xf32>
    %212 = vector.shape_cast %211 : vector<1x16x128xf32> to vector<16x128xf32>
    %213 = vector.shape_cast %210 : vector<16x128xf32> to vector<1x16x128xf32>
    tpu.vector_store %arg13[%c0_60, %c0_61, %c0_62], %213 {strides = array<i32>} : memref<1x16x128xf32, #tpu.memory_space<vmem>>, vector<1x16x128xf32>,
    return
  }
  func.func @transform_0(%arg0: i32, %arg1: i32) -> (i32, i32, i32) {
    %c0_i32 = arith.constant 0 : i32
    %c0_i32_0 = arith.constant 0 : i32
    return %arg0, %arg1, %c0_i32 : i32, i32, i32
  }
  func.func @transform_1(%arg0: i32, %arg1: i32) -> (i32, i32, i32) {
    %c0_i32 = arith.constant 0 : i32
    %c0_i32_0 = arith.constant 0 : i32
    return %arg0, %arg1, %c0_i32 : i32, i32, i32
  }
  func.func @transform_2(%arg0: i32, %arg1: i32) -> (i32, i32, i32, i32) {
    %c0_i32 = arith.constant 0 : i32
    %c0_i32_0 = arith.constant 0 : i32
    %c0_i32_1 = arith.constant 0 : i32
    return %arg0, %c0_i32, %arg1, %c0_i32_0 : i32, i32, i32, i32
  }
  func.func @transform_3(%arg0: i32, %arg1: i32) -> (i32, i32, i32, i32) {
    %c0_i32 = arith.constant 0 : i32
    %c0_i32_0 = arith.constant 0 : i32
    %c0_i32_1 = arith.constant 0 : i32
    return %arg0, %c0_i32, %arg1, %c0_i32_0 : i32, i32, i32, i32
  }
  func.func @transform_4(%arg0: i32, %arg1: i32) -> (i32, i32) {
    %c0_i32 = arith.constant 0 : i32
    %c0_i32_0 = arith.constant 0 : i32
    %c0_i32_1 = arith.constant 0 : i32
    return %c0_i32, %c0_i32_0 : i32, i32
  }
  func.func @transform_5(%arg0: i32, %arg1: i32) -> (i32, i32) {
    %c0_i32 = arith.constant 0 : i32
    %c0_i32_0 = arith.constant 0 : i32
    %c0_i32_1 = arith.constant 0 : i32
    return %c0_i32, %c0_i32_0 : i32, i32
  }
  func.func @transform_6(%arg0: i32, %arg1: i32) -> (i32, i32) {
    %c0_i32 = arith.constant 0 : i32
    %c0_i32_0 = arith.constant 0 : i32
    %c0_i32_1 = arith.constant 0 : i32
    return %c0_i32, %c0_i32_0 : i32, i32
  }
  func.func @transform_7(%arg0: i32, %arg1: i32) -> (i32, i32) {
    %c0_i32 = arith.constant 0 : i32
    %c0_i32_0 = arith.constant 0 : i32
    %c0_i32_1 = arith.constant 0 : i32
    return %c0_i32, %c0_i32_0 : i32, i32
  }
  func.func @transform_8(%arg0: i32, %arg1: i32) -> (i32, i32) {
    %c0_i32 = arith.constant 0 : i32
    %c0_i32_0 = arith.constant 0 : i32
    %c0_i32_1 = arith.constant 0 : i32
    return %c0_i32, %c0_i32_0 : i32, i32
  }
  func.func @transform_9(%arg0: i32, %arg1: i32) -> (i32, i32) {
    %c0_i32 = arith.constant 0 : i32
    %c0_i32_0 = arith.constant 0 : i32
    %c0_i32_1 = arith.constant 0 : i32
    return %c0_i32, %c0_i32_0 : i32, i32
  }
  func.func @transform_10(%arg0: i32, %arg1: i32) -> (i32, i32) {
    %c0_i32 = arith.constant 0 : i32
    %c0_i32_0 = arith.constant 0 : i32
    %c0_i32_1 = arith.constant 0 : i32
    return %c0_i32, %c0_i32_0 : i32, i32
  }
  func.func @transform_11(%arg0: i32, %arg1: i32) -> (i32, i32, i32) {
    %c0_i32 = arith.constant 0 : i32
    %c0_i32_0 = arith.constant 0 : i32
    return %arg0, %arg1, %c0_i32 : i32, i32, i32
  }
}

</mosaic_0001>

<bundles_post_ra>
// kernel: custom-call.10
= control target key start
LH: loop header
LB: loop body
LE: loop exit
PB: predicated region body
PF: predicated region fallthrough
CT: control target
= control target key end

     0   :  { %s6_s0 = inlined_call_operand.vmem [shape: f32[2,64], index: 0, kind: output, shape index: {}]  }

// kernel: graph_attention_conv_layer.1
= control target key start
LH: loop header
LB: loop body
LE: loop exit
PB: predicated region body
PF: predicated region fallthrough
CT: control target
= control target key end

     0   :  { %s2405_s17 = smov 0   ;;  %s2407_s18 = smov 0   ;;  %s2895_s0 = inlined_call_operand.vmem [shape: f32[2,16,8], index: 0, kind: input, shape index: {}]   ;;  %s2896_s1 = inlined_call_operand.vmem [shape: f32[2,16,8], index: 1, kind: input, shape index: {}]   ;;  %s2897_s2 = inlined_call_operand.vmem [shape: f32[2,8,16,8], index: 2, kind: input, shape index: {}]   ;;  %s2898_s3 = inlined_call_operand.vmem [shape: f32[2,8,16,8], index: 3, kind: input, shape index: {}]   ;;  %s2899_s4 = inlined_call_operand.vmem [shape: bf16[8,128], index: 4, kind: input, shape index: {}]   ;;  %s2900_s5 = inlined_call_operand.vmem [shape: bf16[8,128], index: 5, kind: input, shape index: {}]   ;;  %s2901_s6 = inlined_call_operand.vmem [shape: f32[1,128], index: 6, kind: input, shape index: {}]   ;;  %s2902_s7 = inlined_call_operand.vmem [shape: bf16[128,128], index: 7, kind: input, shape index: {}]   ;;  %s2903_s8 = inlined_call_operand.vmem [shape: f32[1,128], index: 8, kind: input, shape index: {}]   ;;  %s2904_s9 = inlined_call_operand.vmem [shape: bf16[8,128], index: 9, kind: input, shape index: {}]   ;;  %s2905_s10 = inlined_call_operand.vmem [shape: bf16[128,128], index: 10, kind: input, shape index: {}]   ;;  %s2906_s11 = inlined_call_operand.vmem [shape: f32[2,16,128], index: 11, kind: output, shape index: {}]  }
   0x1   :  { %s2409_s19 = smov 0  }
   0x2 LB: > { %s33_s20 = sadd.s32 1, %s2337_s18  ;;  %p1901_p0 = scmp.ge.s32.totalorder %s2341_s19, 1  ;;  %s2341_s19 = sphi %s2409_s19, %s21_s19   ;;  %s2337_s18 = sphi %s2407_s18, %s2912_s18   ;;  %s2333_s17 = sphi %s2405_s17, %s2911_s17  }
   0x3   : > { %p35_p1 = scmp.ge.s32.totalorder %s33_s20, 2  ;;  %p409_p2 = scmp.lt.s32.totalorder %s2341_s19, 3 }
   0x5   : > { %s2914_s20 = smov (%p35_p1, %s33_s20), 0  ;;  %p410_p3 = pnand %p1901_p0, %p409_p2 }
   0x6   : > { %p485_p4 = scmp.lt.s32.totalorder (!%p410_p3), %s2333_s17, 1 }
   0x7   : > { %413 = sbr.rel (%p410_p3) target bundleno = 938 (0x3aa), region = 64 }
   0xc   : > { %v553_v0 = vld [vmem:[%s2900_s5] sm:$0xf]  ;;  %vm597_vm0 = vcmask 1043456   ;;  %v2343_v2 = vmov 0.0   ;;  %vm2344_vm1 = vmmov 0   ;;  %s2916_s17 = smov (!%p485_p4, %s2333_s17), 1 }
   0xd   : > { %v552_v1 = vld [vmem:[%s2899_s4] sm:$0xf]  ;;  %2044 = vmatprep.subr.bf16.mxu0 %v2343_v2  ;;  %2050 = vmatprep.subr.bf16.mxu1 %v2343_v2  ;;  %v599_v3 = vsel %vm597_vm0, %v553_v0, 0  ;;  %s2445_s25 = sshll.u32 %s2916_s17, 4  ;;  %v2243_v5 = vld [vmem:[%s2902_s7 + $0x38] sm:$0xff]   ;;  %vm593_vm2 = vcmask 64512  }
   0xe   : > { %v2433_v4 = vsel %vm597_vm0, %v552_v1, 0  ;;  %2045 = vmatpush3.bf16.msra.mxu0 %v599_v3  ;;  %2046 = vmatprep.mubr.msk.bf16.mxu0 %vm2344_vm1, %v2343_v2  ;;  %s502_s30 = scalar_lea.vmem %s2896_s1, %s2445_s25  ;;  %s492_s14 = scalar_lea.vmem %s2895_s0, %s2445_s25  ;;  %v2244_v11 = vld [vmem:[%s2902_s7 + $0x30] sm:$0xff]   ;;  %v2245_v13 = vld [vmem:[%s2902_s7 + $0x28] sm:$0xff]   ;;  %v2246_v14 = vld [vmem:[%s2902_s7 + $0x20] sm:$0xff]  }
   0xf   : > { %2051 = vmatpush3.bf16.msra.mxu1 %v2433_v4  ;;  %2052 = vmatprep.mubr.msk.bf16.mxu1 %vm2344_vm1, %v2343_v2  ;;  %v557_v6 = vld [vmem:[%s502_s30] sm:$0xff]  ;;  %v558_v7 = vld [vmem:[%s502_s30 + $0x8] sm:$0xff]  ;;  %v2247_v15 = vld [vmem:[%s2902_s7 + $0x18] sm:$0xff]   ;;  %s1960_s13 = sshll.u32 %s2916_s17, 7 }
  0x10   : > { %2056 = vmatprep.subr.bf16.mxu0 %v2343_v2  ;;  %2214 = vmatprep.subr.msk.bf16.mxu1 %vm597_vm0, %v553_v0  ;;  %v592_v8 = vpack.c.bf16 %v558_v7, %v557_v6  ;;  %v555_v9 = vld [vmem:[%s492_s14] sm:$0xff]  ;;  %v556_v10 = vld [vmem:[%s492_s14 + $0x8] sm:$0xff]  ;;  %v2248_v16 = vld [vmem:[%s2902_s7 + $0x10] sm:$0xff]   ;;  %s2493_s16 = scalar_lea.vmem %s2898_s3, %s1960_s13  ;;  %s2534_s28 = scalar_lea.vmem %s2897_s2, %s1960_s13 }
  0x11   : > { %v591_v12 = vpack.c.bf16 %v556_v10, %v555_v9  ;;  %v2249_v17 = vld [vmem:[%s2902_s7 + $0x8] sm:$0xff]   ;;  %v2250_v18 = vld [vmem:[%s2902_s7] sm:$0xff]   ;;  %v577_v22 = vld [vmem:[%s2493_s16 + $0x10] sm:$0xff] }
  0x12   : > { %2047 = vmatmul.mubr.msk.bf16.vlgmr.msra.gmra.mxu0 %vm593_vm2, %v592_v8  ;;  %v575_v19 = vld [vmem:[%s2493_s16] sm:$0xff]  ;;  %v576_v20 = vld [vmem:[%s2493_s16 + $0x8] sm:$0xff]  ;;  %v578_v23 = vld [vmem:[%s2493_s16 + $0x18] sm:$0xff] }
  0x13   : > { %2057 = vmatpush3.bf16.msra.mxu0 %v2243_v5  ;;  %2072 = vmatprep.mubr.msk.bf16.mxu0 %vm2344_vm1, %v2343_v2  ;;  %v822_v21 = vpack.c.bf16 %v576_v20, %v575_v19  ;;  %v823_v24 = vpack.c.bf16 %v578_v23, %v577_v22  ;;  %v579_v25 = vld [vmem:[%s2493_s16 + $0x20] sm:$0xff]  ;;  %v580_v26 = vld [vmem:[%s2493_s16 + $0x28] sm:$0xff]  ;;  %v581_v28 = vld [vmem:[%s2493_s16 + $0x30] sm:$0xff] }
  0x14   : > { %2053 = vmatmul.mubr.msk.bf16.vlgmr.msra.gmra.mxu1 %vm593_vm2, %v591_v12  ;;  %2058 = vmatprep.subr.bf16.mxu0 %v2343_v2  ;;  %v824_v27 = vpack.c.bf16 %v580_v26, %v579_v25  ;;  %v582_v29 = vld [vmem:[%s2493_s16 + $0x38] sm:$0xff]  ;;  %v583_v31 = vld [vmem:[%s2493_s16 + $0x40] sm:$0xff]  ;;  %v584_v32 = vld [vmem:[%s2493_s16 + $0x48] sm:$0xff] }
  0x15   : > { %2077 = vmatpush3.bf16.msra.mxu1 %v599_v3  ;;  %2078 = vmatprep.mubr.msk.bf16.mxu1 %vm593_vm2, %v822_v21  ;;  %v825_v30 = vpack.c.bf16 %v582_v29, %v581_v28  ;;  %v826_v33 = vpack.c.bf16 %v584_v32, %v583_v31  ;;  %v585_v34 = vld [vmem:[%s2493_s16 + $0x50] sm:$0xff]  ;;  %v586_v35 = vld [vmem:[%s2493_s16 + $0x58] sm:$0xff]  ;;  %v587_v37 = vld [vmem:[%s2493_s16 + $0x60] sm:$0xff] }
  0x16   : > { %2112 = vmatprep.subr.bf16.mxu1 %v2243_v5  ;;  %v827_v36 = vpack.c.bf16 %v586_v35, %v585_v34  ;;  %v588_v38 = vld [vmem:[%s2493_s16 + $0x68] sm:$0xff]  ;;  %v589_v40 = vld [vmem:[%s2493_s16 + $0x70] sm:$0xff]  ;;  %v590_v41 = vld [vmem:[%s2493_s16 + $0x78] sm:$0xff]  ;;  %s532_s16 = scalar_lea.vmem %s2906_s11, %s2445_s25 }
  0x17   : > { %2059 = vmatpush3.bf16.msra.mxu0 %v2244_v11  ;;  %v828_v39 = vpack.c.bf16 %v588_v38, %v587_v37  ;;  %v829_v42 = vpack.c.bf16 %v590_v41, %v589_v40  ;;  %v2527_v47 = vld [vmem:[%s2901_s6] ss:$0 sm:$0xff]  ;;  %v560_v57 = vld [vmem:[%s2534_s28 + $0x8] sm:$0xff]  ;;  %v561_v62 = vld [vmem:[%s2534_s28 + $0x10] sm:$0xff] }
  0x18   : > { %2060 = vmatprep.subr.bf16.mxu0 %v2343_v2  ;;  %v559_v56 = vld [vmem:[%s2534_s28] sm:$0xff]  ;;  %v562_v63 = vld [vmem:[%s2534_s28 + $0x18] sm:$0xff]  ;;  %v568_v8 = vld [vmem:[%s2534_s28 + $0x48] sm:$0xff] }
  0x19   : > { %v2540_v60 = vpack.c.bf16 %v560_v57, %v559_v56  ;;  %v563_v0 = vld [vmem:[%s2534_s28 + $0x20] sm:$0xff]  ;;  %v2549_v3 = vpack.c.bf16 %v562_v63, %v561_v62  ;;  %v566_v6 = vld [vmem:[%s2534_s28 + $0x38] sm:$0xff]  ;;  %v2597_v21 = vld [vmem:[%s2905_s10 + $0x30] sm:$0xff]  }
  0x1a   : > { %v567_v7 = vld [vmem:[%s2534_s28 + $0x40] sm:$0xff]  ;;  %v570_v12 = vld [vmem:[%s2534_s28 + $0x58] sm:$0xff]  ;;  %v2604_v22 = vld [vmem:[%s2905_s10 + $0x28] sm:$0xff]  }
  0x1b   : > { %2061 = vmatpush3.bf16.msra.mxu0 %v2245_v13  ;;  %v2563_v10 = vpack.c.bf16 %v568_v8, %v567_v7  ;;  %v2590_v20 = vld [vmem:[%s2905_s10 + $0x38] sm:$0xff]   ;;  %v2611_v23 = vld [vmem:[%s2905_s10 + $0x20] sm:$0xff]   ;;  %v2625_v25 = vld [vmem:[%s2905_s10 + $0x10] sm:$0xff]  }
  0x1c   : > { %2062 = vmatprep.subr.bf16.mxu0 %v2343_v2  ;;  %2079 = vmatmul.mubr.msk.bf16.vlgmr.msra.gmra.mxu1 %vm593_vm2, %v823_v24  ;;  %v2618_v24 = vld [vmem:[%s2905_s10 + $0x18] sm:$0xff]   ;;  %v2632_v26 = vld [vmem:[%s2905_s10 + $0x8] sm:$0xff]  }
  0x1d   : > { %2113 = vmatpush3.bf16.msra.mxu1 %v2243_v5  ;;  %2082 = vmatprep.mubr.msk.bf16.mxu1 %vm593_vm2, %v824_v27  ;;  %v2638_v27 = vld [vmem:[%s2905_s10] sm:$0xff]  }
  0x1e   : > { %2114 = vmatprep.subr.bf16.mxu1 %v2244_v11 }
  0x1f   : > { %2063 = vmatpush3.bf16.msra.mxu0 %v2246_v14 }
  0x20   : > { %2064 = vmatprep.subr.bf16.mxu0 %v2343_v2 }
  0x21   : > { %2115 = vmatpush3.bf16.msra.mxu1 %v2244_v11  ;;  %v569_v11 = vld [vmem:[%s2534_s28 + $0x50] sm:$0xff] }
  0x22   : > { %2116 = vmatprep.subr.bf16.mxu1 %v2245_v13 }
  0x23   : > { %2065 = vmatpush3.bf16.msra.mxu0 %v2247_v15 }
  0x24   : > { %2066 = vmatprep.subr.bf16.mxu0 %v2343_v2  ;;  %2083 = vmatmul.mubr.msk.bf16.gmra.mxu1 %vm593_vm2, %v825_v30 }
  0x25   : > { %2117 = vmatpush3.bf16.msra.mxu1 %v2245_v13  ;;  %2086 = vmatprep.mubr.msk.bf16.mxu1 %vm593_vm2, %v826_v33  ;;  %v571_v13 = vld [vmem:[%s2534_s28 + $0x60] sm:$0xff] }
  0x26   : > { %2118 = vmatprep.subr.bf16.mxu1 %v2246_v14 }
  0x27   : > { %2067 = vmatpush3.bf16.msra.mxu0 %v2248_v16 }
  0x28   : > { %2068 = vmatprep.subr.bf16.mxu0 %v2343_v2 }
  0x29   : > { %2119 = vmatpush3.bf16.msra.mxu1 %v2246_v14  ;;  %v572_v14 = vld [vmem:[%s2534_s28 + $0x68] sm:$0xff] }
  0x2a   : > { %2120 = vmatprep.subr.bf16.mxu1 %v2247_v15 }
  0x2b   : > { %2069 = vmatpush3.bf16.msra.mxu0 %v2249_v17 }
  0x2c   : > { %2070 = vmatprep.subr.bf16.mxu0 %v2343_v2  ;;  %2087 = vmatmul.mubr.msk.bf16.gmra.mxu1 %vm593_vm2, %v827_v36 }
  0x2d   : > { %2121 = vmatpush3.bf16.msra.mxu1 %v2247_v15  ;;  %2090 = vmatprep.mubr.msk.bf16.mxu1 %vm593_vm2, %v828_v39  ;;  %v2573_v15 = vpack.c.bf16 %v570_v12, %v569_v11 }
  0x2e   : > { %2122 = vmatprep.subr.bf16.mxu1 %v2248_v16 }
  0x2f   : > { %2071 = vmatpush3.bf16.msra.mxu0 %v2250_v18 }
  0x30   : > { %2215 = vmatprep.subr.msk.bf16.mxu0 %vm597_vm0, %v552_v1  ;;  %v564_v1 = vld [vmem:[%s2534_s28 + $0x28] sm:$0xff] }
  0x31   : > { %2123 = vmatpush3.bf16.msra.mxu1 %v2248_v16  ;;  %v2551_v5 = vpack.c.bf16 %v564_v1, %v563_v0  ;;  %v2575_v16 = vpack.c.bf16 %v572_v14, %v571_v13 }
  0x32   : > { %2124 = vmatprep.subr.bf16.mxu1 %v2249_v17 }
  0x34   : > { %2091 = vmatmul.mubr.msk.bf16.gmra.mxu1 %vm593_vm2, %v829_v42 }
  0x35   : > { %2125 = vmatpush3.bf16.msra.mxu1 %v2249_v17  ;;  %v573_v17 = vld [vmem:[%s2534_s28 + $0x70] sm:$0xff] }
  0x36   : > { %2126 = vmatprep.subr.bf16.mxu1 %v2250_v18 }
  0x39   : > { %2127 = vmatpush3.bf16.msra.mxu1 %v2250_v18  ;;  %v574_v18 = vld [vmem:[%s2534_s28 + $0x78] sm:$0xff] }
  0x3a   : > { %2144 = vmatprep.subr.bf16.mxu1 %v2343_v2  ;;  %v2583_v19 = vpack.c.bf16 %v574_v18, %v573_v17 }
  0xd2   : > { %v635_v43 = vpop.f32.mrf.mxu0 }
  0xd4   : > { %v682_v44 = vpop.f32.mrf.mxu1  ;;  %v2048_v45 = vpop.f32.mrf.mxu0 }
  0xd5   : > { %v683_v46 = vadd.f32 %v682_v44, %v635_v43 }
  0xd6   : > { %v2054_v48 = vpop.f32.mrf.mxu1  ;;  %v638_v49 = vpop.f32.mrf.mxu0 }
  0xd7   : > { %v695_v52 = vadd.f32 %v2527_v47, %v683_v46 }
  0xd8   : > { %v685_v50 = vpop.f32.mrf.mxu1  ;;  %v2049_v51 = vpop.f32.mrf.mxu0 }
  0xd9   : > { %v686_v53 = vadd.f32 %v685_v50, %v638_v49  ;;  %v697_v58 = vmax.f32 %v695_v52, 0.0 }
  0xda   : > { %v2055_v54 = vpop.f32.mrf.mxu1 }
  0xdb   : > { %v696_v55 = vadd.f32 %v2527_v47, %v686_v53 }
  0xdc   : > { %v2080_v28 = vpop.f32.mrf.mxu1 }
  0xdd   : > { %v698_v59 = vmax.f32 %v696_v55, 0.0 }
  0xde   : > { %v888_v29 = vpop.f32.mrf.mxu1 }
  0xdf   : > { %v716_v61 = vpack.c.bf16 %v698_v59, %v697_v58 }
  0xe0   : > { %v2081_v30 = vpop.f32.mrf.mxu1 }
  0xe1   : > { %2073 = vmatmul.mubr.bf16.vlgmr.msra.gmra.mxu0 %v716_v61 }
  0xe2   : > { %2095 = vmatpush3.bf16.msra.mxu0 %v2433_v4  ;;  %2096 = vmatprep.mubr.msk.bf16.mxu0 %vm593_vm2, %v2540_v60  ;;  %v565_v4 = vld [vmem:[%s2534_s28 + $0x30] sm:$0xff]  ;;  %v891_v31 = vpop.f32.mrf.mxu1 }
  0xe3   : > { %v2561_v9 = vpack.c.bf16 %v566_v6, %v565_v4  ;;  %2182 = vmatprep.subr.bf16.mxu0 %v2590_v20 }
  0xe4   : > { %v2084_v32 = vpop.f32.mrf.mxu1 }
  0xe6   : > { %v904_v33 = vpop.f32.mrf.mxu1 }
  0xe8   : > { %v2085_v36 = vpop.f32.mrf.mxu1 }
  0xe9   : > { %2097 = vmatmul.mubr.msk.bf16.vlgmr.msra.gmra.mxu0 %vm593_vm2, %v2549_v3 }
  0xea   : > { %2100 = vmatprep.mubr.msk.bf16.mxu0 %vm593_vm2, %v2551_v5  ;;  %2183 = vmatpush3.bf16.msra.mxu0 %v2590_v20  ;;  %v907_v39 = vpop.f32.mrf.mxu1 }
  0xeb   : > { %2184 = vmatprep.subr.bf16.mxu0 %v2597_v21 }
  0xec   : > { %v2088_v42 = vpop.f32.mrf.mxu1 }
  0xee   : > { %2185 = vmatpush3.bf16.msra.mxu0 %v2597_v21  ;;  %v920_v49 = vpop.f32.mrf.mxu1 }
  0xef   : > { %2186 = vmatprep.subr.bf16.mxu0 %v2604_v22 }
  0xf0   : > { %v2089_v58 = vpop.f32.mrf.mxu1 }
  0xf1   : > { %2101 = vmatmul.mubr.msk.bf16.gmra.mxu0 %vm593_vm2, %v2561_v9 }
  0xf2   : > { %2104 = vmatprep.mubr.msk.bf16.mxu0 %vm593_vm2, %v2563_v10  ;;  %2187 = vmatpush3.bf16.msra.mxu0 %v2604_v22  ;;  %v923_v11 = vpop.f32.mrf.mxu1 }
  0xf3   : > { %2188 = vmatprep.subr.bf16.mxu0 %v2611_v23 }
  0xf6   : > { %2189 = vmatpush3.bf16.msra.mxu0 %v2611_v23 }
  0xf7   : > { %2190 = vmatprep.subr.bf16.mxu0 %v2618_v24 }
  0xf9   : > { %2105 = vmatmul.mubr.msk.bf16.gmra.mxu0 %vm593_vm2, %v2573_v15 }
  0xfa   : > { %2108 = vmatprep.mubr.msk.bf16.mxu0 %vm593_vm2, %v2575_v16  ;;  %2191 = vmatpush3.bf16.msra.mxu0 %v2618_v24 }
  0xfb   : > { %2192 = vmatprep.subr.bf16.mxu0 %v2625_v25 }
  0xfe   : > { %2193 = vmatpush3.bf16.msra.mxu0 %v2625_v25 }
  0xff   : > { %2194 = vmatprep.subr.bf16.mxu0 %v2632_v26 }
 0x101   : > { %2109 = vmatmul.mubr.msk.bf16.gmra.mxu0 %vm593_vm2, %v2583_v19 }
 0x102   : > { %2195 = vmatpush3.bf16.msra.mxu0 %v2632_v26 }
 0x103   : > { %2196 = vmatprep.subr.bf16.mxu0 %v2638_v27 }
 0x106   : > { %2197 = vmatpush3.bf16.msra.mxu0 %v2638_v27 }
 0x1a1   : > { %v2643_v34 = vpop.f32.mrf.mxu0 }
 0x1a3   : > { %v2074_v35 = vpop.f32.mrf.mxu0 }
 0x1a5   : > { %v2645_v37 = vpop.f32.mrf.mxu0 }
 0x1a7   : > { %v2075_v38 = vpop.f32.mrf.mxu0 }
 0x1a9   : > { %v2098_v40 = vpop.f32.mrf.mxu0 }
 0x1aa   : > { %v1018_v44 = vadd.f32 %v2098_v40, %v2080_v28 }
 0x1ab   : > { %v1009_v41 = vpop.f32.mrf.mxu0 }
 0x1ac   : > { %v1010_v43 = vadd.f32 %v1009_v41, %v888_v29  ;;  %v1074_v53 = vadd.f32 %v2527_v47, %v1018_v44 }
 0x1ad   : > { %v2099_v45 = vpop.f32.mrf.mxu0 }
 0x1ae   : > { %v1021_v46 = vadd.f32 %v2099_v45, %v2081_v30  ;;  %v1072_v50 = vadd.f32 %v2527_v47, %v1010_v43  ;;  %v1090_v63 = vmax.f32 %v1074_v53, 0.0  ;;  %v2092_v30 = vpop.f32.mrf.mxu1 }
 0x1af   : > { %v1012_v48 = vpop.f32.mrf.mxu0 }
 0x1b0   : > { %v1075_v51 = vadd.f32 %v2527_v47, %v1021_v46  ;;  %v1013_v52 = vadd.f32 %v1012_v48, %v891_v31  ;;  %v1088_v59 = vmax.f32 %v1072_v50, 0.0  ;;  %v936_v43 = vpop.f32.mrf.mxu1 }
 0x1b1   : > { %v2102_v54 = vpop.f32.mrf.mxu0 }
 0x1b2   : > { %v1073_v55 = vadd.f32 %v2527_v47, %v1013_v52  ;;  %v1091_v56 = vmax.f32 %v1075_v51, 0.0  ;;  %v1034_v0 = vadd.f32 %v2102_v54, %v2084_v32  ;;  %v2093_v51 = vpop.f32.mrf.mxu1 }
 0x1b3   : > { %v1025_v57 = vpop.f32.mrf.mxu0 }
 0x1b4   : > { %v1089_v61 = vmax.f32 %v1073_v55, 0.0  ;;  %v1026_v62 = vadd.f32 %v1025_v57, %v904_v33  ;;  %v1105_v7 = vpack.c.bf16 %v1091_v56, %v1090_v63  ;;  %v1078_v17 = vadd.f32 %v2527_v47, %v1034_v0 }
 0x1b5   : > { %v2103_v1 = vpop.f32.mrf.mxu0 }
 0x1b6   : > { %v1037_v4 = vadd.f32 %v2103_v1, %v2085_v36  ;;  %v1104_v6 = vpack.c.bf16 %v1089_v61, %v1088_v59  ;;  %v1076_v12 = vadd.f32 %v2527_v47, %v1026_v62  ;;  %v1094_v36 = vmax.f32 %v1078_v17, 0.0  ;;  %v939_v62 = vpop.f32.mrf.mxu1 }
 0x1b7   : > { %v1028_v8 = vpop.f32.mrf.mxu0 }
 0x1b8   : > { %v1079_v13 = vadd.f32 %v2527_v47, %v1037_v4  ;;  %v1029_v14 = vadd.f32 %v1028_v8, %v907_v39  ;;  %2128 = vmatprep.mubr.bf16.mxu1 %v1104_v6  ;;  %v1092_v32 = vmax.f32 %v1076_v12, 0.0 }
 0x1b9   : > { %v2106_v18 = vpop.f32.mrf.mxu0  ;;  %2129 = vmatmul.mubr.bf16.vlgmr.msra.gmra.mxu1 %v1105_v7 }
 0x1ba   : > { %v1077_v28 = vadd.f32 %v2527_v47, %v1029_v14  ;;  %2145 = vmatpush3.bf16.msra.mxu1 %v2590_v20  ;;  %v1095_v29 = vmax.f32 %v1079_v13, 0.0  ;;  %v1050_v38 = vadd.f32 %v2106_v18, %v2088_v42  ;;  %v2676_v13 = vld [vmem:[%s2903_s8] ss:$0 sm:$0xff] }
 0x1bb   : > { %v1041_v31 = vpop.f32.mrf.mxu0  ;;  %2146 = vmatprep.subr.bf16.mxu1 %v2343_v2  ;;  %v809_v17 = vadd.f32 %v2676_v13, %v2645_v37 }
 0x1bc   : > { %v1093_v33 = vmax.f32 %v1077_v28, 0.0  ;;  %v1042_v35 = vadd.f32 %v1041_v31, %v920_v49  ;;  %v1107_v45 = vpack.c.bf16 %v1095_v29, %v1094_v36  ;;  %v1082_v49 = vadd.f32 %v2527_v47, %v1050_v38 }
 0x1bd   : > { %v2107_v39 = vpop.f32.mrf.mxu0  ;;  %v813_v18 = vmax.f32 %v809_v17, 0.0 }
 0x1be   : > { %v1053_v40 = vadd.f32 %v2107_v39, %v2089_v58  ;;  %2147 = vmatpush3.bf16.msra.mxu1 %v2597_v21  ;;  %v1106_v41 = vpack.c.bf16 %v1093_v33, %v1092_v32  ;;  %v1080_v20 = vadd.f32 %v2527_v47, %v1042_v35  ;;  %v1098_v56 = vmax.f32 %v1082_v49, 0.0 }
 0x1bf   : > { %v1044_v44 = vpop.f32.mrf.mxu0  ;;  %2148 = vmatprep.subr.bf16.mxu1 %v2343_v2 }
 0x1c0   : > { %v1083_v46 = vadd.f32 %v2527_v47, %v1053_v40  ;;  %v1045_v48 = vadd.f32 %v1044_v44, %v923_v11  ;;  %2132 = vmatprep.mubr.bf16.mxu1 %v1106_v41  ;;  %v1096_v53 = vmax.f32 %v1080_v20, 0.0 }
 0x1c1   : > { %v2110_v50 = vpop.f32.mrf.mxu0  ;;  %2133 = vmatmul.mubr.bf16.gmra.mxu1 %v1107_v45 }
 0x1c2   : > { %v1081_v42 = vadd.f32 %v2527_v47, %v1045_v48  ;;  %2149 = vmatpush3.bf16.msra.mxu1 %v2604_v22  ;;  %v1099_v21 = vmax.f32 %v1083_v46, 0.0  ;;  %v1066_v57 = vadd.f32 %v2110_v50, %v2092_v30 }
 0x1c3   : > { %v1057_v52 = vpop.f32.mrf.mxu0  ;;  %2150 = vmatprep.subr.bf16.mxu1 %v2343_v2 }
 0x1c4   : > { %v1097_v54 = vmax.f32 %v1081_v42, 0.0  ;;  %v1058_v55 = vadd.f32 %v1057_v52, %v936_v43  ;;  %v1109_v0 = vpack.c.bf16 %v1099_v21, %v1098_v56  ;;  %v1086_v6 = vadd.f32 %v2527_v47, %v1066_v57 }
 0x1c5   : > { %v2111_v58 = vpop.f32.mrf.mxu0 }
 0x1c6   : > { %v1069_v59 = vadd.f32 %v2111_v58, %v2093_v51  ;;  %2151 = vmatpush3.bf16.msra.mxu1 %v2611_v23  ;;  %v1108_v61 = vpack.c.bf16 %v1097_v54, %v1096_v53  ;;  %v1084_v22 = vadd.f32 %v2527_v47, %v1058_v55  ;;  %v1102_v12 = vmax.f32 %v1086_v6, 0.0 }
 0x1c7   : > { %v1060_v63 = vpop.f32.mrf.mxu0  ;;  %2152 = vmatprep.subr.bf16.mxu1 %v2343_v2 }
 0x1c8   : > { %v1087_v1 = vadd.f32 %v2527_v47, %v1069_v59  ;;  %v1061_v4 = vadd.f32 %v1060_v63, %v939_v62  ;;  %2136 = vmatprep.mubr.bf16.mxu1 %v1108_v61  ;;  %v1100_v8 = vmax.f32 %v1084_v22, 0.0 }
 0x1c9   : > { %2137 = vmatmul.mubr.bf16.gmra.mxu1 %v1109_v0 }
 0x1ca   : > { %v1085_v7 = vadd.f32 %v2527_v47, %v1061_v4  ;;  %2153 = vmatpush3.bf16.msra.mxu1 %v2618_v24  ;;  %v1103_v23 = vmax.f32 %v1087_v1, 0.0  ;;  %v806_v24 = vadd.f32 %v2676_v13, %v2643_v34  ;;  %v551_v34 = vld [vmem:[%s2904_s9] sm:$0xf] }
 0x1cb   : > { %2154 = vmatprep.subr.bf16.mxu1 %v2343_v2 }
 0x1cc   : > { %v1101_v11 = vmax.f32 %v1085_v7, 0.0  ;;  %v1111_v47 = vpack.c.bf16 %v1103_v23, %v1102_v12 }
 0x1ce   : > { %2155 = vmatpush3.bf16.msra.mxu1 %v2625_v25  ;;  %v1110_v14 = vpack.c.bf16 %v1101_v11, %v1100_v8  ;;  %v812_v25 = vmax.f32 %v806_v24, 0.0 }
 0x1cf   : > { %2156 = vmatprep.subr.bf16.mxu1 %v2343_v2 }
 0x1d0   : > { %2140 = vmatprep.mubr.bf16.mxu1 %v1110_v14  ;;  %v1225_v37 = vpack.c.bf16 %v813_v18, %v812_v25 }
 0x1d1   : > { %2141 = vmatmul.mubr.bf16.gmra.mxu1 %v1111_v47 }
 0x1d2   : > { %2157 = vmatpush3.bf16.msra.mxu1 %v2632_v26  ;;  %2160 = vmatprep.mubr.msk.bf16.mxu1 %vm2344_vm1, %v2343_v2  ;;  %v1324_v26 = vsel %vm597_vm0, %v551_v34, 0 }
 0x1d3   : > { %2158 = vmatprep.subr.bf16.mxu1 %v2343_v2 }
 0x1d6   : > { %2159 = vmatpush3.bf16.msra.mxu1 %v2638_v27 }
 0x1d7   : > { %2216 = vmatprep.subr.msk.bf16.mxu1 %vm597_vm0, %v551_v34 }
 0x1d9   : > { %2161 = vmatmul.mubr.bf16.vlgmr.msra.gmra.mxu1 %v1225_v37 }
 0x1da   : > { %2166 = vmatprep.mubr.msk.bf16.mxu1 %vm593_vm2, %v2540_v60  ;;  %2165 = vmatpush3.bf16.msra.mxu1 %v1324_v26 }
 0x1e1   : > { %2167 = vmatmul.mubr.msk.bf16.vlgmr.msra.gmra.mxu1 %vm593_vm2, %v2549_v3 }
 0x1e2   : > { %2170 = vmatprep.mubr.msk.bf16.mxu1 %vm593_vm2, %v2551_v5 }
 0x1e9   : > { %2171 = vmatmul.mubr.msk.bf16.gmra.mxu1 %vm593_vm2, %v2561_v9 }
 0x1ea   : > { %2174 = vmatprep.mubr.msk.bf16.mxu1 %vm593_vm2, %v2563_v10 }
 0x1f1   : > { %2175 = vmatmul.mubr.msk.bf16.gmra.mxu1 %vm593_vm2, %v2573_v15 }
 0x1f2   : > { %2178 = vmatprep.mubr.msk.bf16.mxu1 %vm593_vm2, %v2575_v16 }
 0x1f9   : > { %2179 = vmatmul.mubr.msk.bf16.gmra.mxu1 %vm593_vm2, %v2583_v19 }
 0x279   : > { %v2130_v2 = vpop.f32.mrf.mxu1 }
 0x27a   : > { %v2717_v10 = vadd.f32 %v2130_v2, %v2676_v13 }
 0x27b   : > { %v1146_v60 = vpop.f32.mrf.mxu1 }
 0x27c   : > { %v2711_v5 = vadd.f32 %v2676_v13, %v1146_v60  ;;  %v1211_v30 = vmax.f32 %v2717_v10, 0.0 }
 0x27d   : > { %v2131_v3 = vpop.f32.mrf.mxu1 }
 0x27e   : > { %v2714_v9 = vadd.f32 %v2131_v3, %v2676_v13  ;;  %v1209_v19 = vmax.f32 %v2711_v5, 0.0 }
 0x27f   : > { %v1149_v27 = vpop.f32.mrf.mxu1 }
 0x280   : > { %v2720_v15 = vadd.f32 %v2676_v13, %v1149_v27  ;;  %v1212_v16 = vmax.f32 %v2714_v9, 0.0 }
 0x281   : > { %v2134_v28 = vpop.f32.mrf.mxu1 }
 0x282   : > { %v1210_v29 = vmax.f32 %v2720_v15, 0.0  ;;  %v1316_v33 = vpack.c.bf16 %v1212_v16, %v1211_v30  ;;  %v2741_v39 = vadd.f32 %v2134_v28, %v2676_v13 }
 0x283   : > { %v1162_v31 = vpop.f32.mrf.mxu1 }
 0x284   : > { %v1315_v32 = vpack.c.bf16 %v1210_v29, %v1209_v19  ;;  %v2735_v36 = vadd.f32 %v2676_v13, %v1162_v31  ;;  %v1215_v46 = vmax.f32 %v2741_v39, 0.0 }
 0x285   : > { %v2135_v35 = vpop.f32.mrf.mxu1 }
 0x286   : > { %v2738_v38 = vadd.f32 %v2135_v35, %v2676_v13  ;;  %2198 = vmatprep.mubr.bf16.mxu0 %v1315_v32  ;;  %v1213_v45 = vmax.f32 %v2735_v36, 0.0 }
 0x287   : > { %v1165_v40 = vpop.f32.mrf.mxu1  ;;  %2199 = vmatmul.mubr.bf16.vlgmr.msra.gmra.mxu0 %v1316_v33 }
 0x288   : > { %v2744_v41 = vadd.f32 %v2676_v13, %v1165_v40  ;;  %v1216_v43 = vmax.f32 %v2738_v38, 0.0 }
 0x289   : > { %v2138_v44 = vpop.f32.mrf.mxu1 }
 0x28a   : > { %v1214_v20 = vmax.f32 %v2744_v41, 0.0  ;;  %v1318_v50 = vpack.c.bf16 %v1216_v43, %v1215_v46  ;;  %v2765_v52 = vadd.f32 %v2138_v44, %v2676_v13 }
 0x28b   : > { %v1178_v48 = vpop.f32.mrf.mxu1 }
 0x28c   : > { %v1317_v49 = vpack.c.bf16 %v1214_v20, %v1213_v45  ;;  %v2759_v21 = vadd.f32 %v2676_v13, %v1178_v48  ;;  %v1219_v59 = vmax.f32 %v2765_v52, 0.0 }
 0x28d   : > { %v2139_v42 = vpop.f32.mrf.mxu1 }
 0x28e   : > { %v2762_v51 = vadd.f32 %v2139_v42, %v2676_v13  ;;  %2202 = vmatprep.mubr.bf16.mxu0 %v1317_v49  ;;  %v1217_v57 = vmax.f32 %v2759_v21, 0.0 }
 0x28f   : > { %v1181_v53 = vpop.f32.mrf.mxu1  ;;  %2203 = vmatmul.mubr.bf16.gmra.mxu0 %v1318_v50 }
 0x290   : > { %v2768_v54 = vadd.f32 %v2676_v13, %v1181_v53  ;;  %v1220_v55 = vmax.f32 %v2762_v51, 0.0 }
 0x291   : > { %v2142_v56 = vpop.f32.mrf.mxu1 }
 0x292   : > { %v1218_v58 = vmax.f32 %v2768_v54, 0.0  ;;  %v1320_v63 = vpack.c.bf16 %v1220_v55, %v1219_v59  ;;  %v2789_v4 = vadd.f32 %v2142_v56, %v2676_v13 }
 0x293   : > { %v1194_v61 = vpop.f32.mrf.mxu1 }
 0x294   : > { %v1319_v62 = vpack.c.bf16 %v1218_v58, %v1217_v57  ;;  %v2783_v22 = vadd.f32 %v2676_v13, %v1194_v61  ;;  %v1223_v14 = vmax.f32 %v2789_v4, 0.0 }
 0x295   : > { %v2143_v0 = vpop.f32.mrf.mxu1 }
 0x296   : > { %v2786_v1 = vadd.f32 %v2143_v0, %v2676_v13  ;;  %2206 = vmatprep.mubr.bf16.mxu0 %v1319_v62  ;;  %v1221_v11 = vmax.f32 %v2783_v22, 0.0 }
 0x297   : > { %v1197_v6 = vpop.f32.mrf.mxu1  ;;  %2207 = vmatmul.mubr.bf16.gmra.mxu0 %v1320_v63 }
 0x298   : > { %v2792_v7 = vadd.f32 %v2676_v13, %v1197_v6  ;;  %v2907_v23 = vmax.f32 %v2786_v1, 0.0 }
 0x299   : > { %v2795_v8 = vpop.f32.mrf.mxu1 }
 0x29a   : > { %v2908_v12 = vmax.f32 %v2792_v7, 0.0  ;;  %v1322_v13 = vpack.c.bf16 %v2907_v23, %v1223_v14 }
 0x29b   : > { %v2162_v17 = vpop.f32.mrf.mxu1 }
 0x29c   : > { %v1321_v47 = vpack.c.bf16 %v2908_v12, %v1221_v11 }
 0x29d   : > { %v2808_v24 = vpop.f32.mrf.mxu1 }
 0x29e   : > { %2210 = vmatprep.mubr.bf16.mxu0 %v1321_v47 }
 0x29f   : > { %v2163_v18 = vpop.f32.mrf.mxu1  ;;  %2211 = vmatmul.mubr.bf16.gmra.mxu0 %v1322_v13 }
 0x2a1   : > { %v2168_v25 = vpop.f32.mrf.mxu1 }
 0x2a3   : > { %v1360_v37 = vpop.f32.mrf.mxu1 }
 0x2a5   : > { %v2169_v34 = vpop.f32.mrf.mxu1 }
 0x2a7   : > { %v1363_v26 = vpop.f32.mrf.mxu1 }
 0x2a9   : > { %v2172_v2 = vpop.f32.mrf.mxu1 }
 0x2ab   : > { %v1376_v32 = vpop.f32.mrf.mxu1 }
 0x2ad   : > { %v2173_v42 = vpop.f32.mrf.mxu1 }
 0x2af   : > { %v1379_v13 = vpop.f32.mrf.mxu1 }
 0x347   : > { %v2200_v60 = vpop.f32.mrf.mxu0 }
 0x348   : > { %v1466_v3 = vadd.f32 %v2200_v60, %v2168_v25 }
 0x349   : > { %v1457_v27 = vpop.f32.mrf.mxu0 }
 0x34a   : > { %v1528_v28 = vsub.f32 %v2795_v8, %v1466_v3  ;;  %v1458_v31 = vadd.f32 %v1457_v27, %v1360_v37 }
 0x34b   : > { %v2201_v33 = vpop.f32.mrf.mxu0 }
 0x34c   : > { %v1532_v35 = vmul.f32 0.2, %v1528_v28  ;;  %v1520_v40 = vsub.f32 %v2795_v8, %v1458_v31  ;;  %v1469_v44 = vadd.f32 %v2201_v33, %v2169_v34  ;;  %vm1530_vm3 = vcmp.gt.f32.partialorder %v1528_v28, 0.0 }
 0x34d   : > { %v1460_v48 = vpop.f32.mrf.mxu0 }
 0x34e   : > { %vm1522_vm4 = vcmp.gt.f32.partialorder %v1520_v40, 0.0  ;;  %v1524_v49 = vmul.f32 0.2, %v1520_v40  ;;  %v1529_v50 = vsub.f32 %v2808_v24, %v1469_v44  ;;  %v1461_v53 = vadd.f32 %v1460_v48, %v1363_v26  ;;  %v2176_v48 = vpop.f32.mrf.mxu1 }
 0x34f   : > { %v2204_v56 = vpop.f32.mrf.mxu0  ;;  %v1534_v61 = vsel %vm1530_vm3, %v1528_v28, %v1532_v35 }
 0x350   : > { %v1526_v62 = vsel %vm1522_vm4, %v1520_v40, %v1524_v49  ;;  %v1482_v63 = vadd.f32 %v2204_v56, %v2172_v2  ;;  %v1533_v6 = vmul.f32 0.2, %v1529_v50  ;;  %v1521_v17 = vsub.f32 %v2808_v24, %v1461_v53 }
 0x351   : > { %v1536_v0 = vmax.f32 %v1526_v62, %v1534_v61  ;;  %v1473_v47 = vpop.f32.mrf.mxu0  ;;  %vm1531_vm5 = vcmp.gt.f32.partialorder %v1529_v50, 0.0 }
 0x352   : > { %v1590_v18 = vsub.f32 %v2795_v8, %v1482_v63  ;;  %v1474_v25 = vadd.f32 %v1473_v47, %v1376_v32  ;;  %vm1523_vm6 = vcmp.gt.f32.partialorder %v1521_v17, 0.0  ;;  %v1525_v60 = vmul.f32 0.2, %v1521_v17 }
 0x353   : > { %v1538_v37 = vsub.f32 %v1526_v62, %v1536_v0  ;;  %v1544_v34 = vsub.f32 %v1534_v61, %v1536_v0  ;;  %v2205_v3 = vpop.f32.mrf.mxu0  ;;  %v1535_v2 = vsel %vm1531_vm5, %v1529_v50, %v1533_v6 }
 0x354   : > { %v1558_v26 = vsub.f32 %v2795_v8, %v1474_v25  ;;  %v1485_v27 = vadd.f32 %v2205_v3, %v2173_v42  ;;  %v1527_v31 = vsel %vm1523_vm6, %v1521_v17, %v1525_v60  ;;  %v1594_v33 = vmul.f32 0.2, %v1590_v18  ;;  %v1392_v25 = vpop.f32.mrf.mxu1 }
 0x355   : > { %v1540_v28 = vmul.f32 1.442695, %v1538_v37  ;;  %v1476_v35 = vpop.f32.mrf.mxu0  ;;  %v1546_v40 = vmul.f32 1.442695, %v1544_v34  ;;  %v1537_v44 = vmax.f32 %v1527_v31, %v1535_v2  ;;  %vm1592_vm8 = vcmp.gt.f32.partialorder %v1590_v18, 0.0 }
 0x356   : > { %vm1560_vm7 = vcmp.gt.f32.partialorder %v1558_v26, 0.0  ;;  %v1562_v49 = vmul.f32 0.2, %v1558_v26  ;;  %v1477_v32 = vadd.f32 %v1476_v35, %v1379_v13  ;;  %v1591_v62 = vsub.f32 %v2808_v24, %v1485_v27 }
 0x357   : > { %v2208_v53 = vpop.f32.mrf.mxu0  ;;  %v1539_v56 = vsub.f32 %v1527_v31, %v1537_v44  ;;  %2259 = vpow2.f32 %v1540_v28  ;;  %v1545_v63 = vsub.f32 %v1535_v2, %v1537_v44  ;;  %v1596_v47 = vsel %vm1592_vm8, %v1590_v18, %v1594_v33 }
 0x358   : > { %v1564_v61 = vsel %vm1560_vm7, %v1558_v26, %v1562_v49  ;;  %v1559_v50 = vsub.f32 %v2808_v24, %v1477_v32  ;;  %2261 = vpow2.f32 %v1546_v40  ;;  %v1498_v37 = vadd.f32 %v2208_v53, %v2176_v48  ;;  %v2177_v40 = vpop.f32.mrf.mxu1 }
 0x359   : > { %v1566_v42 = vmax.f32 %v1536_v0, %v1564_v61  ;;  %v1489_v6 = vpop.f32.mrf.mxu0  ;;  %v1542_v17 = vmul.f32 1.442695, %v1539_v56  ;;  %vm1593_vm9 = vcmp.gt.f32.partialorder %v1591_v62, 0.0  ;;  %v1595_v31 = vmul.f32 0.2, %v1591_v62 }
 0x35a   : > { %v1490_v13 = vadd.f32 %v1489_v6, %v1392_v25  ;;  %vm1561_vm10 = vcmp.gt.f32.partialorder %v1559_v50, 0.0  ;;  %v1563_v26 = vmul.f32 0.2, %v1559_v50  ;;  %v1548_v28 = vmul.f32 1.442695, %v1545_v63 }
 0x35b   : > { %v1568_v34 = vsub.f32 %v1536_v0, %v1566_v42  ;;  %v1574_v60 = vsub.f32 %v1564_v61, %v1566_v42  ;;  %v1598_v3 = vmax.f32 %v1566_v42, %v1596_v47  ;;  %v2209_v27 = vpop.f32.mrf.mxu0  ;;  %2263 = vpow2.f32 %v1542_v17 }
 0x35c   : > { %v1565_v56 = vsel %vm1561_vm10, %v1559_v50, %v1563_v26  ;;  %v1654_v18 = vsub.f32 %v2795_v8, %v1498_v37  ;;  %v1622_v48 = vsub.f32 %v2795_v8, %v1490_v13  ;;  %v1597_v53 = vsel %vm1593_vm9, %v1591_v62, %v1595_v31 }
 0x35d   : > { %v1570_v2 = vmul.f32 1.442695, %v1568_v34  ;;  %v1576_v35 = vmul.f32 1.442695, %v1574_v60  ;;  %v1600_v49 = vsub.f32 %v1566_v42, %v1598_v3  ;;  %v1606_v32 = vsub.f32 %v1596_v47, %v1598_v3  ;;  %v1492_v6 = vpop.f32.mrf.mxu0  ;;  %v1395_v42 = vpop.f32.mrf.mxu1 }
 0x35e   : > { %v1567_v33 = vmax.f32 %v1537_v44, %v1565_v56  ;;  %v1501_v61 = vadd.f32 %v2209_v27, %v2177_v40  ;;  %vm1656_vm11 = vcmp.gt.f32.partialorder %v1654_v18, 0.0  ;;  %v1658_v17 = vmul.f32 0.2, %v1654_v18 }
 0x35f   : > { %2265 = vpow2.f32 %v1570_v2  ;;  %v1602_v0 = vmul.f32 1.442695, %v1600_v49  ;;  %vm1624_vm12 = vcmp.gt.f32.partialorder %v1622_v48, 0.0  ;;  %v1626_v50 = vmul.f32 0.2, %v1622_v48  ;;  %v2212_v62 = vpop.f32.mrf.mxu0 }
 0x360   : > { %2267 = vpow2.f32 %v1576_v35  ;;  %v1569_v63 = vsub.f32 %v1537_v44, %v1567_v33  ;;  %v2821_v25 = vmax.f32 %v1567_v33, %v1597_v53  ;;  %v1608_v47 = vmul.f32 1.442695, %v1606_v32 }
 0x361   : > { %2269 = vpow2.f32 %v1548_v28  ;;  %v1575_v34 = vsub.f32 %v1565_v56, %v1567_v33  ;;  %v1628_v60 = vsel %vm1624_vm12, %v1622_v48, %v1626_v50  ;;  %v1655_v13 = vsub.f32 %v2808_v24, %v1501_v61  ;;  %v2180_v28 = vpop.f32.mrf.mxu1  ;;  %v1505_v61 = vpop.f32.mrf.mxu0 }
 0x362   : > { %2271 = vpow2.f32 %v1602_v0  ;;  %v1572_v37 = vmul.f32 1.442695, %v1569_v63  ;;  %v1493_v26 = vadd.f32 %v1492_v6, %v1395_v42  ;;  %v1601_v31 = vsub.f32 %v1567_v33, %v2821_v25 }
 0x363   : > { %v1660_v27 = vsel %vm1656_vm11, %v1654_v18, %v1658_v17  ;;  %v1630_v2 = vmax.f32 %v1598_v3, %v1628_v60  ;;  %v1578_v49 = vmul.f32 1.442695, %v1575_v34  ;;  %v1607_v40 = vsub.f32 %v1597_v53, %v2821_v25  ;;  %v1408_v53 = vpop.f32.mrf.mxu1 }
 0x364   : > { %2273 = vpow2.f32 %v1572_v37  ;;  %v2260_v44 = vpop.eup %2259  ;;  %v1623_v32 = vsub.f32 %v2808_v24, %v1493_v26  ;;  %vm1657_vm13 = vcmp.gt.f32.partialorder %v1655_v13, 0.0  ;;  %v1659_v48 = vmul.f32 0.2, %v1655_v13 }
 0x365   : > { %v2262_v35 = vpop.eup %2261  ;;  %2275 = vpow2.f32 %v1608_v47  ;;  %v1632_v56 = vsub.f32 %v1598_v3, %v1630_v2  ;;  %v1638_v0 = vsub.f32 %v1628_v60, %v1630_v2  ;;  %v1604_v6 = vmul.f32 1.442695, %v1601_v31 }
 0x366   : > { %v2827_v63 = vmax.f32 %v1630_v2, %v1660_v27  ;;  %vm1625_vm14 = vcmp.gt.f32.partialorder %v1623_v32, 0.0  ;;  %v1627_v33 = vmul.f32 0.2, %v1623_v32  ;;  %v1552_v18 = vmul.f32 %v2260_v44, %v1209_v19 }
 0x367   : > { %v1554_v42 = vmul.f32 %v2262_v35, %v1211_v30  ;;  %v1634_v17 = vmul.f32 1.442695, %v1632_v56  ;;  %v1514_v50 = vadd.f32 %v2212_v62, %v2180_v28  ;;  %v1550_v3 = vadd.f32 %v2262_v35, %v2260_v44 }
 0x368   : > { %v2264_v47 = vpop.eup %2263  ;;  %2277 = vpow2.f32 %v1578_v49  ;;  %v1640_v37 = vmul.f32 1.442695, %v1638_v0  ;;  %v1506_v34 = vadd.f32 %v1505_v61, %v1408_v53  ;;  %v1664_v26 = vsub.f32 %v1630_v2, %v2827_v63  ;;  %v2213_v61 = vpop.f32.mrf.mxu0 }
 0x369   : > { %2279 = vpow2.f32 %v1634_v17  ;;  %v1629_v31 = vsel %vm1625_vm14, %v1623_v32, %v1627_v33  ;;  %v1610_v5 = vmul.f32 1.442695, %v1607_v40  ;;  %v1556_v10 = vadd.f32 %v1554_v42, %v1552_v18 }
 0x36a   : > { %2281 = vpow2.f32 %v1604_v6  ;;  %v2835_v30 = vsel %vm1657_vm13, %v1655_v13, %v1659_v48  ;;  %v1631_v62 = vmax.f32 %v2821_v25, %v1629_v31  ;;  %v1718_v44 = vsub.f32 %v2795_v8, %v1514_v50  ;;  %v1508_v17 = vpop.f32.mrf.mxu0 }
 0x36b   : > { %2283 = vpow2.f32 %v1640_v37  ;;  %v1670_v35 = vsub.f32 %v1660_v27, %v2827_v63  ;;  %v1686_v2 = vsub.f32 %v2795_v8, %v1506_v34  ;;  %v1666_v56 = vmul.f32 1.442695, %v1664_v26 }
 0x36c   : > { %v2266_v60 = vpop.eup %2265  ;;  %v1633_v0 = vsub.f32 %v2821_v25, %v1631_v62  ;;  %v1553_v13 = vmul.f32 %v2264_v47, %v1210_v29  ;;  %2285 = vpow2.f32 %v1610_v5  ;;  %v1639_v8 = vsub.f32 %v1629_v31, %v1631_v62 }
 0x36d   : > { %v2268_v23 = vpop.eup %2267  ;;  %v1580_v12 = vmul.f32 %v2266_v60, %v1550_v3  ;;  %v1584_v32 = vmul.f32 %v2266_v60, %v1556_v10  ;;  %vm1688_vm15 = vcmp.gt.f32.partialorder %v1686_v2, 0.0  ;;  %v1690_v33 = vmul.f32 0.2, %v1686_v2 }
 0x36e   : > { %v2270_v19 = vpop.eup %2269  ;;  %v1586_v40 = vmul.f32 %v2268_v23, %v1213_v45  ;;  %v1636_v6 = vmul.f32 1.442695, %v1633_v0  ;;  %v1672_v36 = vmul.f32 1.442695, %v1670_v35  ;;  %v2181_v45 = vpop.f32.mrf.mxu1  ;;  %v1722_v25 = vmul.f32 0.2, %v1718_v44 }
 0x36f   : > { %v1582_v28 = vadd.f32 %v2268_v23, %v1580_v12  ;;  %v2272_v49 = vpop.eup %2271  ;;  %v1555_v48 = vmul.f32 %v2270_v19, %v1212_v16  ;;  %v1551_v18 = vadd.f32 %v2270_v19, %v2264_v47  ;;  %v2849_v23 = vmax.f32 %v1631_v62, %v2835_v30 }
 0x370   : > { %v1588_v29 = vadd.f32 %v1586_v40, %v1584_v32  ;;  %2287 = vpow2.f32 %v1666_v56  ;;  %vm1720_vm0 = vcmp.gt.f32.partialorder %v1718_v44, 0.0  ;;  %v1692_v16 = vsel %vm1688_vm15, %v1686_v2, %v1690_v33  ;;  %v1411_v60 = vpop.f32.mrf.mxu1 }
 0x371   : > { %v1612_v12 = vmul.f32 %v2272_v49, %v1582_v28  ;;  %v2274_v27 = vpop.eup %2273  ;;  %2289 = vpow2.f32 %v1636_v6  ;;  %v1517_v42 = vadd.f32 %v2213_v61, %v2181_v45  ;;  %v1557_v53 = vadd.f32 %v1555_v48, %v1553_v13 }
 0x372   : > { %v2276_v15 = vpop.eup %2275  ;;  %v1581_v9 = vmul.f32 %v2274_v27, %v1551_v18  ;;  %v1642_v3 = vmul.f32 1.442695, %v1639_v8  ;;  %v1694_v47 = vmax.f32 %v2827_v63, %v1692_v16  ;;  %2291 = vpow2.f32 %v1672_v36 }
 0x373   : > { %v1614_v50 = vadd.f32 %v2276_v15, %v1612_v12  ;;  %v1618_v37 = vmul.f32 %v2276_v15, %v1215_v46  ;;  %v1665_v34 = vsub.f32 %v1631_v62, %v2849_v23  ;;  %v1724_v26 = vsel %vm1720_vm0, %v1718_v44, %v1722_v25 }
 0x374   : > { %v1616_v5 = vmul.f32 %v2272_v49, %v1588_v29  ;;  %v1696_v19 = vsub.f32 %v2827_v63, %v1694_v47  ;;  %v1702_v10 = vsub.f32 %v1692_v16, %v1694_v47  ;;  %v1509_v28 = vadd.f32 %v1508_v17, %v1411_v60 }
 0x375   : > { %v2278_v31 = vpop.eup %2277  ;;  %v1585_v32 = vmul.f32 %v2274_v27, %v1557_v53  ;;  %v1726_v40 = vmax.f32 %v1694_v47, %v1724_v26  ;;  %v1719_v56 = vsub.f32 %v2808_v24, %v1517_v42  ;;  %2293 = vpow2.f32 %v1642_v3 }
 0x376   : > { %v2280_v35 = vpop.eup %2279  ;;  %v1583_v2 = vadd.f32 %v2278_v31, %v1581_v9  ;;  %v1671_v46 = vsub.f32 %v2835_v30, %v2849_v23  ;;  %v1698_v62 = vmul.f32 1.442695, %v1696_v19  ;;  %v1668_v44 = vmul.f32 1.442695, %v1665_v34 }
 0x377   : > { %v2282_v0 = vpop.eup %2281  ;;  %v1644_v39 = vmul.f32 %v2280_v35, %v1614_v50  ;;  %v1704_v13 = vmul.f32 1.442695, %v1702_v10  ;;  %v1728_v49 = vsub.f32 %v1694_v47, %v1726_v40  ;;  %v1734_v48 = vsub.f32 %v1724_v26, %v1726_v40 }
 0x378   : > { %v2284_v63 = vpop.eup %2283  ;;  %v1587_v12 = vmul.f32 %v2278_v31, %v1214_v20  ;;  %v1620_v61 = vadd.f32 %v1618_v37, %v1616_v5  ;;  %2295 = vpow2.f32 %v1698_v62  ;;  %v1687_v27 = vsub.f32 %v2808_v24, %v1509_v28 }
 0x379   : > { %v1613_v6 = vmul.f32 %v2282_v0, %v1583_v2  ;;  %v1646_v8 = vadd.f32 %v2284_v63, %v1644_v39  ;;  %v1730_v33 = vmul.f32 1.442695, %v1728_v49  ;;  %v1723_v18 = vmul.f32 0.2, %v1719_v56  ;;  %v2286_v36 = vpop.eup %2285 }
 0x37a   : > { %2297 = vpow2.f32 %v1704_v13  ;;  %v1736_v30 = vmul.f32 1.442695, %v1734_v48  ;;  %vm1689_vm1 = vcmp.gt.f32.partialorder %v1687_v27, 0.0  ;;  %v1691_v45 = vmul.f32 0.2, %v1687_v27 }
 0x37b   : > { %2299 = vpow2.f32 %v1668_v44  ;;  %v1674_v25 = vmul.f32 1.442695, %v1671_v46  ;;  %vm1721_vm2 = vcmp.gt.f32.partialorder %v1719_v56, 0.0  ;;  %v1589_v15 = vadd.f32 %v1587_v12, %v1585_v32 }
 0x37c   : > { %2301 = vpow2.f32 %v1730_v33  ;;  %v1693_v41 = vsel %vm1689_vm1, %v1687_v27, %v1691_v45  ;;  %v1648_v29 = vmul.f32 %v2280_v35, %v1620_v61  ;;  %v1615_v9 = vadd.f32 %v2286_v36, %v1613_v6 }
 0x37d   : > { %v2288_v20 = vpop.eup %2287  ;;  %v1695_v24 = vmax.f32 %v2849_v23, %v1693_v41  ;;  %v1650_v42 = vmul.f32 %v2284_v63, %v1217_v57  ;;  %2303 = vpow2.f32 %v1736_v30  ;;  %v1725_v53 = vsel %vm1721_vm2, %v1719_v56, %v1723_v18 }
 0x37e   : > { %v2290_v16 = vpop.eup %2289  ;;  %v1676_v17 = vmul.f32 %v2288_v20, %v1646_v8  ;;  %2305 = vpow2.f32 %v1674_v25  ;;  %v1617_v34 = vmul.f32 %v2282_v0, %v1589_v15  ;;  %v1619_v21 = vmul.f32 %v2286_v36, %v1216_v43 }
 0x37f   : > { %v1697_v50 = vsub.f32 %v2849_v23, %v1695_v24  ;;  %v1703_v3 = vsub.f32 %v1693_v41, %v1695_v24  ;;  %v1727_v47 = vmax.f32 %v1695_v24, %v1725_v53  ;;  %v2292_v37 = vpop.eup %2291  ;;  %v1645_v60 = vmul.f32 %v2290_v16, %v1615_v9 }
 0x380   : > { %v1652_v19 = vadd.f32 %v1650_v42, %v1648_v29  ;;  %v1678_v10 = vadd.f32 %v2292_v37, %v1676_v17  ;;  %v1621_v32 = vadd.f32 %v1619_v21, %v1617_v34  ;;  %v1682_v62 = vmul.f32 %v2292_v37, %v1219_v59 }
 0x381   : > { %v1700_v26 = vmul.f32 1.442695, %v1697_v50  ;;  %v1706_v31 = vmul.f32 1.442695, %v1703_v3  ;;  %v1729_v5 = vsub.f32 %v1695_v24, %v1727_v47  ;;  %v1735_v28 = vsub.f32 %v1725_v53, %v1727_v47 }
 0x382   : > { %v2294_v35 = vpop.eup %2293  ;;  %v1680_v56 = vmul.f32 %v2288_v20, %v1652_v19  ;;  %v1649_v49 = vmul.f32 %v2290_v16, %v1621_v32  ;;  %v2909_v24 = vmax.f32 %v2792_v7, 0.0  ;;  %v2910_v50 = vmax.f32 %v2786_v1, 0.0 }
 0x383   : > { %2307 = vpow2.f32 %v1700_v26  ;;  %v1732_v57 = vmul.f32 1.442695, %v1729_v5  ;;  %v1647_v23 = vadd.f32 %v2294_v35, %v1645_v60  ;;  %v1738_v40 = vmul.f32 1.442695, %v1735_v28 }
 0x384   : > { %2309 = vpow2.f32 %v1706_v31  ;;  %v1651_v38 = vmul.f32 %v2294_v35, %v1218_v58  ;;  %v1684_v48 = vadd.f32 %v1682_v62, %v1680_v56 }
 0x385   : > { %v2296_v2 = vpop.eup %2295  ;;  %2311 = vpow2.f32 %v1732_v57 }
 0x386   : > { %v1708_v0 = vmul.f32 %v2296_v2, %v1678_v10  ;;  %2313 = vpow2.f32 %v1738_v40  ;;  %v1653_v6 = vadd.f32 %v1651_v38, %v1649_v49  ;;  %v1712_v33 = vmul.f32 %v2296_v2, %v1684_v48 }
 0x387   : > { %v2298_v39 = vpop.eup %2297 }
 0x388   : > { %v2300_v46 = vpop.eup %2299  ;;  %v1710_v44 = vadd.f32 %v2298_v39, %v1708_v0  ;;  %v1714_v52 = vmul.f32 %v2298_v39, %v1221_v11 }
 0x389   : > { %v2302_v13 = vpop.eup %2301  ;;  %v1677_v43 = vmul.f32 %v2300_v46, %v1647_v23  ;;  %v1681_v18 = vmul.f32 %v2300_v46, %v1653_v6 }
 0x38a   : > { %v1740_v63 = vmul.f32 %v2302_v13, %v1710_v44  ;;  %v2304_v12 = vpop.eup %2303  ;;  %v1716_v54 = vadd.f32 %v1714_v52, %v1712_v33 }
 0x38b   : > { %v2306_v61 = vpop.eup %2305  ;;  %v1746_v22 = vmul.f32 %v2304_v12, %v1223_v14 }
 0x38c   : > { %v1742_v27 = vadd.f32 %v2304_v12, %v1740_v63  ;;  %v1679_v8 = vadd.f32 %v2306_v61, %v1677_v43  ;;  %v1683_v58 = vmul.f32 %v2306_v61, %v1220_v55  ;;  %v1744_v29 = vmul.f32 %v2302_v13, %v1716_v54 }
 0x38e   : > { %2315 = vrcp.f32 %v1742_v27  ;;  %v1685_v15 = vadd.f32 %v1683_v58, %v1681_v18  ;;  %v1748_v42 = vadd.f32 %v1746_v22, %v1744_v29 }
 0x390   : > { %v2308_v59 = vpop.eup %2307 }
 0x391   : > { %v1709_v36 = vmul.f32 %v2308_v59, %v1679_v8  ;;  %v2310_v30 = vpop.eup %2309  ;;  %v1713_v11 = vmul.f32 %v2308_v59, %v1685_v15 }
 0x392   : > { %v2312_v25 = vpop.eup %2311  ;;  %v1715_v16 = vmul.f32 %v2310_v30, %v2909_v24 }
 0x393   : > { %v1711_v45 = vadd.f32 %v2310_v30, %v1709_v36  ;;  %v2314_v20 = vpop.eup %2313 }
 0x394   : > { %v1717_v55 = vadd.f32 %v1715_v16, %v1713_v11  ;;  %v1747_v3 = vmul.f32 %v2314_v20, %v2910_v50 }
 0x395   : > { %v1741_v41 = vmul.f32 %v2312_v25, %v1711_v45 }
 0x396   : > { %v1745_v53 = vmul.f32 %v2312_v25, %v1717_v55 }
 0x397   : > { %v1743_v9 = vadd.f32 %v2314_v20, %v1741_v41 }
 0x398   : > { %v1749_v4 = vadd.f32 %v1747_v3, %v1745_v53 }
 0x399   : > { %2317 = vrcp.f32 %v1743_v9 }
 0x39b   : > { %v2316_v17 = vpop.eup %2315 }
 0x39c   : > { %v1752_v51 = vmul.f32 %v2316_v17, %v1748_v42 }
 0x39e   : > { %1754 = vst [vmem:[%s532_s16] sm:$0xff] %v1752_v51 }
 0x3a6   : > { %v2318_v14 = vpop.eup %2317 }
 0x3a7   : > { %v1753_v47 = vmul.f32 %v2318_v14, %v1749_v4 }
 0x3a9   : > { %1755 = vst [vmem:[%s532_s16 + $0x8] sm:$0xff] %v1753_v47 }
 0x3aa PF: > { %s21_s19 = sadd.s32 1, %s2341_s19   ;;  %s2911_s17 = smov %s2337_s18 }
 0x3ab   : > { %p18_p5 = scmp.ge.s32.totalorder %s21_s19, 4   ;;  %s2912_s18 = smov %s2914_s20 }
 0x3ad   :  { %20 = sbr.rel (!%p18_p5) target bundleno = 2 (0x2), region = 103 }

</bundles_post_ra>
